<compile_context>
chip_gen: v7x
topology: tpu7x:2x2x1
jax: 0.10.0
libtpu: 0.0.40
codegen_flags: <defaults>
</compile_context>

<pallas_src>
import functools

import jax
import jax.numpy as jnp
from jax.experimental import pallas as pl
from jax.experimental.pallas import tpu as pltpu

NEG_SLOPE = 0.01   # nn.LeakyReLU default
LN_EPS = 1e-5      # nn.LayerNorm default
LANE = 128         # TPU lane width


def _round_up(n, m):
    return ((n + m - 1) // m) * m


def _default_num_parallel():
    """2 parallel grid steps on v7x (2 TensorCores/chip), 1 otherwise."""
    try:
        kind = jax.devices()[0].device_kind.lower().replace(" ", "")
    except Exception:
        return 1
    return 2 if ("v7" in kind or "tpu7" in kind) else 1


def _leaky_relu(x):
    return jnp.where(x > 0, x, NEG_SLOPE * x)


def _masked_layer_norm(h, gamma, beta, n_real):
    """LayerNorm over the first `n_real` lanes of a lane-padded (tb, 128) tile.

    Padded lanes of `h` are exactly zero on entry (zero-padded weights/bias),
    so the plain sum equals the sum over real features.  The centered term is
    masked so padded lanes don't pollute the variance, and zero-padded
    gamma/beta map padded lanes back to exactly zero for the next layer.
    """
    d_pad = h.shape[-1]
    inv_n = 1.0 / float(n_real)
    mean = jnp.sum(h, axis=-1, keepdims=True) * inv_n
    lane = jax.lax.broadcasted_iota(jnp.int32, (1, d_pad), 1)
    c = jnp.where(lane < n_real, h - mean, 0.0)
    var = jnp.sum(c * c, axis=-1, keepdims=True) * inv_n
    inv = jax.lax.rsqrt(var + LN_EPS)
    return c * inv * gamma + beta


def _mlp_kernel(x_ref,
                w1_ref, b1_ref, g1_ref, be1_ref,
                w2_ref, b2_ref, g2_ref, be2_ref,
                w3_ref, b3_ref,
                o_ref, *, n1, n2):
    wdt = w1_ref.dtype            # MXU operand dtype (bf16 or f32), set in prep
    x = x_ref[...].astype(wdt)

    # ---- layer 1: Linear -> LeakyReLU -> LayerNorm -------------------------
    h = jnp.dot(x, w1_ref[...], preferred_element_type=jnp.float32) + b1_ref[...]
    h = _leaky_relu(h)
    h = _masked_layer_norm(h, g1_ref[...], be1_ref[...], n1)

    # ---- layer 2: Linear -> LeakyReLU -> LayerNorm -------------------------
    h = jnp.dot(h.astype(wdt), w2_ref[...],
                preferred_element_type=jnp.float32) + b2_ref[...]
    h = _leaky_relu(h)
    h = _masked_layer_norm(h, g2_ref[...], be2_ref[...], n2)

    # ---- final Linear (no activation / norm), lane-dense store -------------
    out = jnp.dot(h.astype(wdt), w3_ref[...],
                  preferred_element_type=jnp.float32) + b3_ref[...]
    o_ref[...] = out.astype(o_ref.dtype)


def prepare_params(params, dims=(10, 50, 50, 2), *, use_bf16_matmul=True):
    """One-time parameter prep: lane-pad hidden/output dims, cast weights.

    Weights are stored (in, out) (== torch Linear.weight.T).  Only w1's
    *output* dim is padded; its input dim stays at dims[0] so the unpadded
    activations contract directly.  Biases / LN affines stay f32.
    """
    d0, d1, d2, d3 = dims
    p1, p2, p3 = (_round_up(d, LANE) for d in (d1, d2, d3))
    wdt = jnp.bfloat16 if use_bf16_matmul else jnp.float32

    def pad2(a, rows, cols, dtype):
        z = jnp.zeros((rows, cols), dtype)
        return z.at[: a.shape[0], : a.shape[1]].set(a.astype(dtype))

    return {
        "w1": pad2(params["w1"], d0, p1, wdt),
        "b1": pad2(params["b1"], 1, p1, jnp.float32),
        "g1": pad2(params["g1"], 1, p1, jnp.float32),
        "be1": pad2(params["be1"], 1, p1, jnp.float32),
        "w2": pad2(params["w2"], p1, p2, wdt),
        "b2": pad2(params["b2"], 1, p2, jnp.float32),
        "g2": pad2(params["g2"], 1, p2, jnp.float32),
        "be2": pad2(params["be2"], 1, p2, jnp.float32),
        "w3": pad2(params["w3"], p2, p3, wdt),
        "b3": pad2(params["b3"], 1, p3, jnp.float32),
    }


_PARAM_ORDER = ("w1", "b1", "g1", "be1", "w2", "b2", "g2", "be2", "w3", "b3")


def mlp_forward(x, prepared, dims=(10, 50, 50, 2), *, num_parallel_steps=None):
    """x: (B, dims[0]) f32.  prepared: output of prepare_params (already
    padded / cast; NOT rebuilt per call)."""
    B, d_in = x.shape
    assert d_in == dims[0]
    out_pad = prepared["b3"].shape[-1]

    if num_parallel_steps is None:
        num_parallel_steps = _default_num_parallel()

    # One grid step per TensorCore; each step's tile is the whole per-core
    # batch slab (VMEM use is < 2 MiB even at thousands of rows).
    tb = _round_up(pl.cdiv(B, num_parallel_steps), 8)
    Bp = tb * num_parallel_steps
    x_p = x if Bp == B else jnp.zeros((Bp, d_in), x.dtype).at[:B].set(x)

    flat = [prepared[k] for k in _PARAM_ORDER]

    def _resident(p):   # full-array block, same block every grid step
        return pl.BlockSpec(p.shape, lambda i: (0, 0))

    in_specs = [pl.BlockSpec((tb, d_in), lambda i: (i, 0))]
    in_specs += [_resident(p) for p in flat]
    out_spec = pl.BlockSpec((tb, out_pad), lambda i: (i, 0))

    kernel = functools.partial(_mlp_kernel, n1=int(dims[1]), n2=int(dims[2]))

    out = pl.pallas_call(
        kernel,
        out_shape=jax.ShapeDtypeStruct((Bp, out_pad), jnp.float32),
        grid_spec=pl.GridSpec(
            grid=(Bp // tb,),
            in_specs=in_specs,
            out_specs=out_spec,
        ),
        compiler_params=pltpu.CompilerParams(
            dimension_semantics=("parallel",),
        ),
    )(x_p, *flat)

    return out[:B, : dims[-1]]


def init_params(key, dims=(10, 50, 50, 2)):
    """Deterministic synthetic parameters matching the torch module's shapes."""
    ks = jax.random.split(key, 2 * (len(dims) - 1) + 4)
    params = {}
    names = [("w1", "b1"), ("w2", "b2"), ("w3", "b3")]
    for idx, (d_in, d_out) in enumerate(zip(dims[:-1], dims[1:])):
        kw, kb = ks[2 * idx], ks[2 * idx + 1]
        bound = 1.0 / jnp.sqrt(d_in)
        # weight stored as (in, out): equals torch Linear.weight.T
        params[names[idx][0]] = jax.random.uniform(
            kw, (d_in, d_out), jnp.float32, -bound, bound)
        params[names[idx][1]] = jax.random.uniform(
            kb, (1, d_out), jnp.float32, -bound, bound)
    # LayerNorm affine params (only the first two norms are used in forward).
    # Randomized (instead of ones/zeros) so the affine path is exercised.
    params["g1"] = jax.random.uniform(ks[-4], (1, dims[1]), jnp.float32, 0.5, 1.5)
    params["be1"] = 0.1 * jax.random.normal(ks[-3], (1, dims[1]), jnp.float32)
    params["g2"] = jax.random.uniform(ks[-2], (1, dims[2]), jnp.float32, 0.5, 1.5)
    params["be2"] = 0.1 * jax.random.normal(ks[-1], (1, dims[2]), jnp.float32)
    return params


def _layer_norm_ref(x, gamma, beta):
    mean = jnp.mean(x, axis=-1, keepdims=True)
    c = x - mean
    var = jnp.mean(c * c, axis=-1, keepdims=True)
    return c * jax.lax.rsqrt(var + LN_EPS) * gamma + beta


def mlp_reference(x, params):
    """Pure-JAX f32 reference of the torch forward for sanity checking."""
    h = x @ params["w1"] + params["b1"]
    h = _leaky_relu(h)
    h = _layer_norm_ref(h, params["g1"], params["be1"])
    h = h @ params["w2"] + params["b2"]
    h = _leaky_relu(h)
    h = _layer_norm_ref(h, params["g2"], params["be2"])
    return h @ params["w3"] + params["b3"]


if __name__ == "__main__":
    key = jax.random.PRNGKey(0)
    k_param, k_x = jax.random.split(key)

    dims = (10, 50, 50, 2)
    B = 200   # small, deliberately not tile-aligned; wrapper pads then slices

    params = init_params(k_param, dims)
    x = jax.random.normal(k_x, (B, dims[0]), jnp.float32)
    ref = mlp_reference(x, params)

    # --- f32 MXU path: bit-accurate check ----------------------------------
    prep_f32 = prepare_params(params, dims, use_bf16_matmul=False)
    out_f32 = jax.block_until_ready(mlp_forward(x, prep_f32, dims))
    assert out_f32.shape == (B, dims[-1]), out_f32.shape
    assert jnp.allclose(out_f32, ref, atol=1e-4, rtol=1e-4), (
        "f32 path mismatch vs reference, max abs err = "
        f"{float(jnp.max(jnp.abs(out_f32 - ref)))}")

    # --- bf16 MXU path (default for production): looser tolerance ----------
    prep_bf16 = prepare_params(params, dims, use_bf16_matmul=True)
    out_bf16 = jax.block_until_ready(mlp_forward(x, prep_bf16, dims))
    assert out_bf16.shape == (B, dims[-1]), out_bf16.shape
    assert jnp.allclose(out_bf16, ref, atol=5e-2, rtol=5e-2), (
        "bf16 path mismatch vs reference, max abs err = "
        f"{float(jnp.max(jnp.abs(out_bf16 - ref)))}")

    print("KERNEL_OK")
</pallas_src>

<mosaic_0001>
module attributes {stable_mosaic.version = 11 : i64} {
  func.func @_mlp_kernel(%arg0: i32, %arg1: memref<200x10xf32, #tpu.memory_space<vmem>>, %arg2: memref<10x128xf32, #tpu.memory_space<vmem>>, %arg3: memref<1x128xf32, #tpu.memory_space<vmem>>, %arg4: memref<1x128xf32, #tpu.memory_space<vmem>>, %arg5: memref<1x128xf32, #tpu.memory_space<vmem>>, %arg6: memref<128x128xf32, #tpu.memory_space<vmem>>, %arg7: memref<1x128xf32, #tpu.memory_space<vmem>>, %arg8: memref<1x128xf32, #tpu.memory_space<vmem>>, %arg9: memref<1x128xf32, #tpu.memory_space<vmem>>, %arg10: memref<128x128xf32, #tpu.memory_space<vmem>>, %arg11: memref<1x128xf32, #tpu.memory_space<vmem>>, %arg12: memref<200x128xf32, #tpu.memory_space<vmem>>) attributes {dimension_semantics = [#tpu.dimension_semantics<parallel>], iteration_bounds = array<i64: 1>, scalar_prefetch = 0 : i64, scratch_operands = 0 : i64, tpu.core_type = #tpu.core_type<tc>, window_params = [{transform_indices = @transform_0, window_bounds = array<i64: 200, 10>}, {pipeline_mode = #tpu.pipeline_mode<synchronous>, transform_indices = @transform_1, window_bounds = array<i64: 10, 128>}, {pipeline_mode = #tpu.pipeline_mode<synchronous>, transform_indices = @transform_2, window_bounds = array<i64: 1, 128>}, {pipeline_mode = #tpu.pipeline_mode<synchronous>, transform_indices = @transform_3, window_bounds = array<i64: 1, 128>}, {pipeline_mode = #tpu.pipeline_mode<synchronous>, transform_indices = @transform_4, window_bounds = array<i64: 1, 128>}, {pipeline_mode = #tpu.pipeline_mode<synchronous>, transform_indices = @transform_5, window_bounds = array<i64: 128, 128>}, {pipeline_mode = #tpu.pipeline_mode<synchronous>, transform_indices = @transform_6, window_bounds = array<i64: 1, 128>}, {pipeline_mode = #tpu.pipeline_mode<synchronous>, transform_indices = @transform_7, window_bounds = array<i64: 1, 128>}, {pipeline_mode = #tpu.pipeline_mode<synchronous>, transform_indices = @transform_8, window_bounds = array<i64: 1, 128>}, {pipeline_mode = #tpu.pipeline_mode<synchronous>, transform_indices = @transform_9, window_bounds = array<i64: 128, 128>}, {pipeline_mode = #tpu.pipeline_mode<synchronous>, transform_indices = @transform_10, window_bounds = array<i64: 1, 128>}, {transform_indices = @transform_11, window_bounds = array<i64: 200, 128>}]} {
    %c0 = arith.constant 0 : index
    %c0_0 = arith.constant 0 : index
    %0 = vector.load %arg1[%c0, %c0_0] : memref<200x10xf32, #tpu.memory_space<vmem>>, vector<200x10xf32>
    %c0_1 = arith.constant 0 : index
    %c0_2 = arith.constant 0 : index
    %1 = vector.load %arg2[%c0_1, %c0_2] : memref<10x128xf32, #tpu.memory_space<vmem>>, vector<10x128xf32>
    %cst = arith.constant dense<0.000000e+00> : vector<200x128xf32>
    %2 = tpu.matmul %0, %1, %cst {dimension_numbers = #tpu.dot_dimension_numbers<[1], [0], [0], [1], [0, 0, 1, 1], [], []>} : vector<200x10xf32>, vector<10x128xf32>, vector<200x128xf32> -> vector<200x128xf32>
    %c0_3 = arith.constant 0 : index
    %c0_4 = arith.constant 0 : index
    %3 = vector.load %arg3[%c0_3, %c0_4] : memref<1x128xf32, #tpu.memory_space<vmem>>, vector<1x128xf32>
    %4 = vector.broadcast %3 : vector<1x128xf32> to vector<200x128xf32>
    %5 = arith.addf %2, %4 : vector<200x128xf32>
    %cst_5 = arith.constant 0.000000e+00 : f32
    %6 = vector.broadcast %cst_5 : f32 to vector<200x128xf32>
    %7 = arith.cmpf ogt, %5, %6 : vector<200x128xf32>
    %cst_6 = arith.constant 0.00999999977 : f32
    %8 = vector.broadcast %cst_6 : f32 to vector<200x128xf32>
    %9 = arith.mulf %8, %5 : vector<200x128xf32>
    %10 = arith.select %7, %5, %9 : vector<200x128xi1>, vector<200x128xf32>
    %c0_7 = arith.constant 0 : index
    %c0_8 = arith.constant 0 : index
    %11 = vector.load %arg4[%c0_7, %c0_8] : memref<1x128xf32, #tpu.memory_space<vmem>>, vector<1x128xf32>
    %c0_9 = arith.constant 0 : index
    %c0_10 = arith.constant 0 : index
    %12 = vector.load %arg5[%c0_9, %c0_10] : memref<1x128xf32, #tpu.memory_space<vmem>>, vector<1x128xf32>
    %cst_11 = arith.constant dense<0.000000e+00> : vector<200xf32>
    %13 = vector.multi_reduction <add>, %10, %cst_11 [1] : vector<200x128xf32> to vector<200xf32>
    %14 = vector.shape_cast %13 : vector<200xf32> to vector<200x1xf32>
    %cst_12 = arith.constant 2.000000e-02 : f32
    %15 = vector.broadcast %cst_12 : f32 to vector<200x1xf32>
    %16 = arith.mulf %14, %15 : vector<200x1xf32>
    %17 = tpu.iota {dimensions = array<i32: 1>} : vector<1x128xi32>
    %c50_i32 = arith.constant 50 : i32
    %18 = vector.broadcast %c50_i32 : i32 to vector<1x128xi32>
    %19 = arith.cmpi slt, %17, %18 : vector<1x128xi32>
    %20 = vector.broadcast %16 : vector<200x1xf32> to vector<200x128xf32>
    %21 = arith.subf %10, %20 : vector<200x128xf32>
    %cst_13 = arith.constant 0.000000e+00 : f32
    %22 = vector.shape_cast %19 : vector<1x128xi1> to vector<1x128xi1>
    %23 = vector.broadcast %22 : vector<1x128xi1> to vector<200x128xi1>
    %24 = vector.broadcast %cst_13 : f32 to vector<200x128xf32>
    %25 = arith.select %23, %21, %24 : vector<200x128xi1>, vector<200x128xf32>
    %26 = arith.mulf %25, %25 : vector<200x128xf32>
    %cst_14 = arith.constant dense<0.000000e+00> : vector<200xf32>
    %27 = vector.multi_reduction <add>, %26, %cst_14 [1] : vector<200x128xf32> to vector<200xf32>
    %28 = vector.shape_cast %27 : vector<200xf32> to vector<200x1xf32>
    %cst_15 = arith.constant 2.000000e-02 : f32
    %29 = vector.broadcast %cst_15 : f32 to vector<200x1xf32>
    %30 = arith.mulf %28, %29 : vector<200x1xf32>
    %cst_16 = arith.constant 9.99999974E-6 : f32
    %31 = vector.broadcast %cst_16 : f32 to vector<200x1xf32>
    %32 = arith.addf %30, %31 : vector<200x1xf32>
    %33 = math.rsqrt %32 : vector<200x1xf32>
    %34 = vector.broadcast %33 : vector<200x1xf32> to vector<200x128xf32>
    %35 = arith.mulf %25, %34 : vector<200x128xf32>
    %36 = vector.broadcast %11 : vector<1x128xf32> to vector<200x128xf32>
    %37 = arith.mulf %35, %36 : vector<200x128xf32>
    %38 = vector.broadcast %12 : vector<1x128xf32> to vector<200x128xf32>
    %39 = arith.addf %37, %38 : vector<200x128xf32>
    %c0_17 = arith.constant 0 : index
    %c0_18 = arith.constant 0 : index
    %40 = vector.load %arg6[%c0_17, %c0_18] : memref<128x128xf32, #tpu.memory_space<vmem>>, vector<128x128xf32>
    %cst_19 = arith.constant dense<0.000000e+00> : vector<200x128xf32>
    %41 = tpu.matmul %39, %40, %cst_19 {dimension_numbers = #tpu.dot_dimension_numbers<[1], [0], [0], [1], [0, 0, 1, 1], [], []>} : vector<200x128xf32>, vector<128x128xf32>, vector<200x128xf32> -> vector<200x128xf32>
    %c0_20 = arith.constant 0 : index
    %c0_21 = arith.constant 0 : index
    %42 = vector.load %arg7[%c0_20, %c0_21] : memref<1x128xf32, #tpu.memory_space<vmem>>, vector<1x128xf32>
    %43 = vector.broadcast %42 : vector<1x128xf32> to vector<200x128xf32>
    %44 = arith.addf %41, %43 : vector<200x128xf32>
    %cst_22 = arith.constant 0.000000e+00 : f32
    %45 = vector.broadcast %cst_22 : f32 to vector<200x128xf32>
    %46 = arith.cmpf ogt, %44, %45 : vector<200x128xf32>
    %cst_23 = arith.constant 0.00999999977 : f32
    %47 = vector.broadcast %cst_23 : f32 to vector<200x128xf32>
    %48 = arith.mulf %47, %44 : vector<200x128xf32>
    %49 = arith.select %46, %44, %48 : vector<200x128xi1>, vector<200x128xf32>
    %c0_24 = arith.constant 0 : index
    %c0_25 = arith.constant 0 : index
    %50 = vector.load %arg8[%c0_24, %c0_25] : memref<1x128xf32, #tpu.memory_space<vmem>>, vector<1x128xf32>
    %c0_26 = arith.constant 0 : index
    %c0_27 = arith.constant 0 : index
    %51 = vector.load %arg9[%c0_26, %c0_27] : memref<1x128xf32, #tpu.memory_space<vmem>>, vector<1x128xf32>
    %cst_28 = arith.constant dense<0.000000e+00> : vector<200xf32>
    %52 = vector.multi_reduction <add>, %49, %cst_28 [1] : vector<200x128xf32> to vector<200xf32>
    %53 = vector.shape_cast %52 : vector<200xf32> to vector<200x1xf32>
    %cst_29 = arith.constant 2.000000e-02 : f32
    %54 = vector.broadcast %cst_29 : f32 to vector<200x1xf32>
    %55 = arith.mulf %53, %54 : vector<200x1xf32>
    %56 = tpu.iota {dimensions = array<i32: 1>} : vector<1x128xi32>
    %c50_i32_30 = arith.constant 50 : i32
    %57 = vector.broadcast %c50_i32_30 : i32 to vector<1x128xi32>
    %58 = arith.cmpi slt, %56, %57 : vector<1x128xi32>
    %59 = vector.broadcast %55 : vector<200x1xf32> to vector<200x128xf32>
    %60 = arith.subf %49, %59 : vector<200x128xf32>
    %cst_31 = arith.constant 0.000000e+00 : f32
    %61 = vector.shape_cast %58 : vector<1x128xi1> to vector<1x128xi1>
    %62 = vector.broadcast %61 : vector<1x128xi1> to vector<200x128xi1>
    %63 = vector.broadcast %cst_31 : f32 to vector<200x128xf32>
    %64 = arith.select %62, %60, %63 : vector<200x128xi1>, vector<200x128xf32>
    %65 = arith.mulf %64, %64 : vector<200x128xf32>
    %cst_32 = arith.constant dense<0.000000e+00> : vector<200xf32>
    %66 = vector.multi_reduction <add>, %65, %cst_32 [1] : vector<200x128xf32> to vector<200xf32>
    %67 = vector.shape_cast %66 : vector<200xf32> to vector<200x1xf32>
    %cst_33 = arith.constant 2.000000e-02 : f32
    %68 = vector.broadcast %cst_33 : f32 to vector<200x1xf32>
    %69 = arith.mulf %67, %68 : vector<200x1xf32>
    %cst_34 = arith.constant 9.99999974E-6 : f32
    %70 = vector.broadcast %cst_34 : f32 to vector<200x1xf32>
    %71 = arith.addf %69, %70 : vector<200x1xf32>
    %72 = math.rsqrt %71 : vector<200x1xf32>
    %73 = vector.broadcast %72 : vector<200x1xf32> to vector<200x128xf32>
    %74 = arith.mulf %64, %73 : vector<200x128xf32>
    %75 = vector.broadcast %50 : vector<1x128xf32> to vector<200x128xf32>
    %76 = arith.mulf %74, %75 : vector<200x128xf32>
    %77 = vector.broadcast %51 : vector<1x128xf32> to vector<200x128xf32>
    %78 = arith.addf %76, %77 : vector<200x128xf32>
    %c0_35 = arith.constant 0 : index
    %c0_36 = arith.constant 0 : index
    %79 = vector.load %arg10[%c0_35, %c0_36] : memref<128x128xf32, #tpu.memory_space<vmem>>, vector<128x128xf32>
    %cst_37 = arith.constant dense<0.000000e+00> : vector<200x128xf32>
    %80 = tpu.matmul %78, %79, %cst_37 {dimension_numbers = #tpu.dot_dimension_numbers<[1], [0], [0], [1], [0, 0, 1, 1], [], []>} : vector<200x128xf32>, vector<128x128xf32>, vector<200x128xf32> -> vector<200x128xf32>
    %c0_38 = arith.constant 0 : index
    %c0_39 = arith.constant 0 : index
    %81 = vector.load %arg11[%c0_38, %c0_39] : memref<1x128xf32, #tpu.memory_space<vmem>>, vector<1x128xf32>
    %82 = vector.broadcast %81 : vector<1x128xf32> to vector<200x128xf32>
    %83 = arith.addf %80, %82 : vector<200x128xf32>
    %c0_40 = arith.constant 0 : index
    %c0_41 = arith.constant 0 : index
    %84 = vector.load %arg12[%c0_40, %c0_41] : memref<200x128xf32, #tpu.memory_space<vmem>>, vector<200x128xf32>
    tpu.vector_store %arg12[%c0_40, %c0_41], %83 {strides = array<i32>} : memref<200x128xf32, #tpu.memory_space<vmem>>, vector<200x128xf32>,
    return
  }
  func.func @transform_0(%arg0: i32) -> (i32, i32) {
    %c0_i32 = arith.constant 0 : i32
    %c0_i32_0 = arith.constant 0 : i32
    return %arg0, %c0_i32 : i32, i32
  }
  func.func @transform_1(%arg0: i32) -> (i32, i32) {
    %c0_i32 = arith.constant 0 : i32
    %c0_i32_0 = arith.constant 0 : i32
    %c0_i32_1 = arith.constant 0 : i32
    return %c0_i32, %c0_i32_0 : i32, i32
  }
  func.func @transform_2(%arg0: i32) -> (i32, i32) {
    %c0_i32 = arith.constant 0 : i32
    %c0_i32_0 = arith.constant 0 : i32
    %c0_i32_1 = arith.constant 0 : i32
    return %c0_i32, %c0_i32_0 : i32, i32
  }
  func.func @transform_3(%arg0: i32) -> (i32, i32) {
    %c0_i32 = arith.constant 0 : i32
    %c0_i32_0 = arith.constant 0 : i32
    %c0_i32_1 = arith.constant 0 : i32
    return %c0_i32, %c0_i32_0 : i32, i32
  }
  func.func @transform_4(%arg0: i32) -> (i32, i32) {
    %c0_i32 = arith.constant 0 : i32
    %c0_i32_0 = arith.constant 0 : i32
    %c0_i32_1 = arith.constant 0 : i32
    return %c0_i32, %c0_i32_0 : i32, i32
  }
  func.func @transform_5(%arg0: i32) -> (i32, i32) {
    %c0_i32 = arith.constant 0 : i32
    %c0_i32_0 = arith.constant 0 : i32
    %c0_i32_1 = arith.constant 0 : i32
    return %c0_i32, %c0_i32_0 : i32, i32
  }
  func.func @transform_6(%arg0: i32) -> (i32, i32) {
    %c0_i32 = arith.constant 0 : i32
    %c0_i32_0 = arith.constant 0 : i32
    %c0_i32_1 = arith.constant 0 : i32
    return %c0_i32, %c0_i32_0 : i32, i32
  }
  func.func @transform_7(%arg0: i32) -> (i32, i32) {
    %c0_i32 = arith.constant 0 : i32
    %c0_i32_0 = arith.constant 0 : i32
    %c0_i32_1 = arith.constant 0 : i32
    return %c0_i32, %c0_i32_0 : i32, i32
  }
  func.func @transform_8(%arg0: i32) -> (i32, i32) {
    %c0_i32 = arith.constant 0 : i32
    %c0_i32_0 = arith.constant 0 : i32
    %c0_i32_1 = arith.constant 0 : i32
    return %c0_i32, %c0_i32_0 : i32, i32
  }
  func.func @transform_9(%arg0: i32) -> (i32, i32) {
    %c0_i32 = arith.constant 0 : i32
    %c0_i32_0 = arith.constant 0 : i32
    %c0_i32_1 = arith.constant 0 : i32
    return %c0_i32, %c0_i32_0 : i32, i32
  }
  func.func @transform_10(%arg0: i32) -> (i32, i32) {
    %c0_i32 = arith.constant 0 : i32
    %c0_i32_0 = arith.constant 0 : i32
    %c0_i32_1 = arith.constant 0 : i32
    return %c0_i32, %c0_i32_0 : i32, i32
  }
  func.func @transform_11(%arg0: i32) -> (i32, i32) {
    %c0_i32 = arith.constant 0 : i32
    %c0_i32_0 = arith.constant 0 : i32
    return %arg0, %c0_i32 : i32, i32
  }
}

</mosaic_0001>

<bundles_post_ra>
// kernel: tpu_custom_call.1
= control target key start
LH: loop header
LB: loop body
LE: loop exit
PB: predicated region body
PF: predicated region fallthrough
CT: control target
= control target key end

     0   :  { %16 = vsyncpa [#allocation3], 0  ;;  %s3771_s0 = inlined_call_operand.vmem [shape: f32[200,10], index: 0, kind: input, shape index: {}]   ;;  %s3772_s1 = inlined_call_operand.hbm [shape: f32[10,128], index: 1, kind: input, shape index: {}]   ;;  %s3773_s2 = inlined_call_operand.vmem [shape: f32[1,128], index: 2, kind: input, shape index: {}]   ;;  %s3774_s3 = inlined_call_operand.vmem [shape: f32[1,128], index: 3, kind: input, shape index: {}]   ;;  %s3775_s4 = inlined_call_operand.hbm [shape: f32[1,128], index: 4, kind: input, shape index: {}]   ;;  %s3776_s5 = inlined_call_operand.vmem [shape: f32[128,128], index: 5, kind: input, shape index: {}]   ;;  %s3777_s6 = inlined_call_operand.hbm [shape: f32[1,128], index: 6, kind: input, shape index: {}]   ;;  %s3778_s7 = inlined_call_operand.hbm [shape: f32[1,128], index: 7, kind: input, shape index: {}]   ;;  %s3779_s8 = inlined_call_operand.vmem [shape: f32[1,128], index: 8, kind: input, shape index: {}]   ;;  %s3780_s9 = inlined_call_operand.vmem [shape: f32[128,128], index: 9, kind: input, shape index: {}]   ;;  %s3781_s10 = inlined_call_operand.vmem [shape: f32[1,128], index: 10, kind: input, shape index: {}]   ;;  %s3782_s11 = inlined_call_operand.hbm [shape: f32[200,128], index: 11, kind: output, shape index: {}]  }
   0x1   :  { %17 = vsyncpa [#allocation6], 0 }
   0x2   :  { %18 = vsyncpa [#allocation9], 0 }
   0x3   :  { %19 = vsyncpa [#allocation4], 0  ;;  %s2463_s17 = smov [#allocation5]   ;;  %s2464_s19 = smov [#allocation2]  }
   0x4   :  { %s44_s18 = sshll.u32 %s2463_s17, 4  ;;  %s27_s20 = sshll.u32 %s2464_s19, 4  ;;  %s45_s18 = int_to_ptr.vmem [resolvable:$true] %s44_s18  ;;  %s2534_s20 = int_to_ptr.vmem [resolvable:$true] %s27_s20 }
   0x5   :  { %s2345_s23 = scalar_lea.hbm %s3775_s4, 16 }
   0x6   :  { %p2346_p0 = scmp.ne.s32.totalorder %s3775_s4, %s2345_s23  ;;  %p2349_p1 = scmp.lt.u32.totalorder %s2345_s23, %s3775_s4 }
   0x8   :  { %p2351_p2 = pnand %p2349_p1, %p2346_p0 }
   0xa   :  { %2354 = shalt.err (!%p2351_p2)
}
   0xb   :  { %s2355_s28 = scalar_lea.vmem %s45_s18, 16  ;;  %s2359_s29 = scalar_lea.vmem %s45_s18, 32 }
   0xc   :  { %p2356_p3 = scmp.ne.s32.totalorder %s45_s18, %s2355_s28  ;;  %p2360_p4 = scmp.lt.s32.totalorder %s45_s18, %s45_s18 }
   0xd   :  { %p2361_p5 = scmp.lt.s32.totalorder %s2359_s29, %s2355_s28 }
   0xf   :  { %p2362_p6 = por %p2361_p5, %p2360_p4 }
  0x11   :  { %p2363_p7 = pnand %p2362_p6, %p2356_p3 }
  0x13   :  { %2366 = shalt.err (!%p2363_p7)
}
  0x14   :  { %47 = dma.hbm_to_vmem [thread:$0]  %s3775_s4, 16, %s45_s18, [#allocation6]  }
  0x15   :  { %s2367_s15 = scalar_lea.hbm %s3772_s1, 256 }
  0x16   :  { %p2368_p8 = scmp.ne.s32.totalorder %s3772_s1, %s2367_s15  ;;  %p2371_p9 = scmp.lt.u32.totalorder %s2367_s15, %s3772_s1 }
  0x18   :  { %p2373_p10 = pnand %p2371_p9, %p2368_p8 }
  0x1a   :  { %2376 = shalt.err (!%p2373_p10)
}
  0x1b   :  { %s2377_s22 = scalar_lea.vmem %s2534_s20, 256  ;;  %p2382_p12 = scmp.lt.s32.totalorder %s2534_s20, %s2534_s20 }
  0x1c   :  { %p2378_p11 = scmp.ne.s32.totalorder %s2534_s20, %s2377_s22  ;;  %p2383_p13 = scmp.lt.s32.totalorder %s2377_s22, %s2377_s22 }
  0x1e   :  { %p2384_p0 = por %p2383_p13, %p2382_p12 }
  0x20   :  { %p2385_p1 = pnand %p2384_p0, %p2378_p11 }
  0x22   :  { %2388 = shalt.err (!%p2385_p1)
}
  0x23   :  { %s2465_s4 = smov 128   ;;  %s2466_s18 = smov 8  }
  0x24   :  { %33 = dma.hbm_to_vmem [thread:$0]  %s3772_s1, 256, %s2534_s20, [#allocation3], %s2465_s4, %s2465_s4, %s2466_s18  }
  0x25   :  { %s2467_s25 = smov [#allocation7]   ;;  %s2468_s27 = smov [#allocation8]  }
  0x26   :  { %s56_s26 = sshll.u32 %s2467_s25, 4  ;;  %s66_s28 = sshll.u32 %s2468_s27, 4  ;;  %s57_s26 = int_to_ptr.vmem [resolvable:$true] %s56_s26  ;;  %s67_s28 = int_to_ptr.vmem [resolvable:$true] %s66_s28 }
  0x27   :  { %s2389_s12 = scalar_lea.hbm %s3777_s6, 16 }
  0x28   :  { %p2390_p2 = scmp.ne.s32.totalorder %s3777_s6, %s2389_s12  ;;  %p2393_p3 = scmp.lt.u32.totalorder %s2389_s12, %s3777_s6 }
  0x2a   :  { %p2395_p4 = pnand %p2393_p3, %p2390_p2 }
  0x2c   :  { %2398 = shalt.err (!%p2395_p4)
}
  0x2d   :  { %s2399_s1 = scalar_lea.vmem %s57_s26, 16  ;;  %s2403_s20 = scalar_lea.vmem %s57_s26, 32 }
  0x2e   :  { %p2400_p5 = scmp.ne.s32.totalorder %s57_s26, %s2399_s1  ;;  %p2404_p6 = scmp.lt.s32.totalorder %s57_s26, %s57_s26 }
  0x2f   :  { %p2405_p7 = scmp.lt.s32.totalorder %s2403_s20, %s2399_s1 }
  0x31   :  { %p2406_p8 = por %p2405_p7, %p2404_p6 }
  0x33   :  { %p2407_p9 = pnand %p2406_p8, %p2400_p5 }
  0x35   :  { %2410 = shalt.err (!%p2407_p9)
}
  0x36   :  { %59 = dma.hbm_to_vmem [thread:$0]  %s3777_s6, 16, %s57_s26, [#allocation6]  }
  0x37   :  { %s2411_s23 = scalar_lea.hbm %s3778_s7, 16 }
  0x38   :  { %p2412_p10 = scmp.ne.s32.totalorder %s3778_s7, %s2411_s23  ;;  %p2415_p11 = scmp.lt.u32.totalorder %s2411_s23, %s3778_s7 }
  0x3a   :  { %p2417_p12 = pnand %p2415_p11, %p2412_p10 }
  0x3c   :  { %2420 = shalt.err (!%p2417_p12)
}
  0x3d   :  { %s2421_s30 = scalar_lea.vmem %s67_s28, 16  ;;  %s2425_s12 = scalar_lea.vmem %s67_s28, 32 }
  0x3e   :  { %p2422_p13 = scmp.ne.s32.totalorder %s67_s28, %s2421_s30  ;;  %p2426_p0 = scmp.lt.s32.totalorder %s67_s28, %s67_s28 }
  0x3f   :  { %p2427_p1 = scmp.lt.s32.totalorder %s2425_s12, %s2421_s30 }
  0x41   :  { %p2428_p2 = por %p2427_p1, %p2426_p0 }
  0x43   :  { %p2429_p3 = pnand %p2428_p2, %p2422_p13 }
  0x45   :  { %2432 = shalt.err (!%p2429_p3)
}
  0x46   :  { %69 = dma.hbm_to_vmem [thread:$0]  %s3778_s7, 16, %s67_s28, [#allocation9]  }
  0x47   :  { %2455 = dma.done.wait [#allocation3], 256  }
  0x48   :  { %2456 = vsyncadd [#allocation3], 4294967040 }
  0x49   :  { %2457 = dma.done.wait [#allocation6], 32  }
  0x4a   :  { %2458 = vsyncadd [#allocation6], 4294967264 }
  0x4b   :  { %2459 = dma.done.wait [#allocation9], 16  }
  0x4c   :  { %2460 = vsyncadd [#allocation9], 4294967280  ;;  %v2469_v0 = vmov 0.0|0.0   ;;  %vm2470_vm0 = vmmov 0   ;;  %v2471_v1 = vmov 0.0   ;;  %vm198_vm1 = vcmask 1041408  }
  0x4d   :  { %2180 = vmatprep.subr.bf16.mxu0 %v2469_v0  ;;  %2232 = vmatprep.subr.bf16.mxu1 %v2469_v0  ;;  %v113_v2 = vld [vmem:[#allocation2] sm:$0xff]  ;;  %v114_v3 = vld [vmem:[#allocation2 + $0x8] sm:$0x3]  ;;  %vm2472_vm2 = vmmov 1   ;;  %v88_v5 = vld [vmem:[%s3771_s0] sm:$0xff]  ;;  %vm122_vm4 = vcmask 80896  }
  0x4e   :  { %1891 = vmatprep.mubr.msk.f32.mxu0 %vm2470_vm0, %v2471_v1  ;;  %1930 = vmatprep.mubr.msk.f32.mxu1 %vm2470_vm0, %v2471_v1  ;;  %vm2182_vm3 = vmpackc.low %vm198_vm1, %vm2472_vm2  ;;  %v2181_v4 = vpack.c.bf16 %v114_v3, %v113_v2  ;;  %v101_v6 = vld [vmem:[%s3771_s0 + $0x68] sm:$0xff]  ;;  %v102_v8 = vld [vmem:[%s3771_s0 + $0x70] sm:$0xff] }
  0x4f   :  { %v89_v7 = vld [vmem:[%s3771_s0 + $0x8] sm:$0xff]  ;;  %v90_v9 = vld [vmem:[%s3771_s0 + $0x10] sm:$0xff]  ;;  %v103_v10 = vld [vmem:[%s3771_s0 + $0x78] sm:$0xff] }
  0x50   :  { %2183 = vmatpush3.bf16.msk.msra.mxu0 %vm2182_vm3, %v2181_v4  ;;  %2233 = vmatpush3.bf16.msk.msra.mxu1 %vm2182_vm3, %v2181_v4  ;;  %v91_v11 = vld [vmem:[%s3771_s0 + $0x18] sm:$0xff]  ;;  %v104_v12 = vld [vmem:[%s3771_s0 + $0x80] sm:$0xff]  ;;  %v105_v14 = vld [vmem:[%s3771_s0 + $0x88] sm:$0xff] }
  0x51   :  { %2184 = vmatprep.subr.bf16.mxu1 %v2469_v0  ;;  %2208 = vmatprep.subr.bf16.mxu0 %v2469_v0  ;;  %v92_v13 = vld [vmem:[%s3771_s0 + $0x20] sm:$0xff]  ;;  %v93_v15 = vld [vmem:[%s3771_s0 + $0x28] sm:$0xff]  ;;  %v106_v16 = vld [vmem:[%s3771_s0 + $0x90] sm:$0xff] }
  0x52   :  { %v94_v17 = vld [vmem:[%s3771_s0 + $0x30] sm:$0xff]  ;;  %v107_v18 = vld [vmem:[%s3771_s0 + $0x98] sm:$0xff]  ;;  %v108_v20 = vld [vmem:[%s3771_s0 + $0xa0] sm:$0xff] }
  0x53   :  { %1892 = vmatmul.mubr.msk.f32.vlgmr.msra.gmra.mrb[0].mxu0 %vm122_vm4, %v88_v5  ;;  %1931 = vmatmul.mubr.msk.f32.vlgmr.msra.gmra.mrb[0].mxu1 %vm122_vm4, %v101_v6  ;;  %v95_v19 = vld [vmem:[%s3771_s0 + $0x38] sm:$0xff]  ;;  %v96_v21 = vld [vmem:[%s3771_s0 + $0x40] sm:$0xff]  ;;  %v109_v22 = vld [vmem:[%s3771_s0 + $0xa8] sm:$0xff] }
  0x54   :  { %1894 = vmatprep.mubr.msk.f32.mxu0 %vm2470_vm0, %v2471_v1  ;;  %1933 = vmatprep.mubr.msk.f32.mxu1 %vm2470_vm0, %v2471_v1  ;;  %v97_v23 = vld [vmem:[%s3771_s0 + $0x48] sm:$0xff]  ;;  %v110_v24 = vld [vmem:[%s3771_s0 + $0xb0] sm:$0xff]  ;;  %v111_v26 = vld [vmem:[%s3771_s0 + $0xb8] sm:$0xff] }
  0x55   :  { %v98_v25 = vld [vmem:[%s3771_s0 + $0x50] sm:$0xff]  ;;  %v99_v27 = vld [vmem:[%s3771_s0 + $0x58] sm:$0xff]  ;;  %v112_v28 = vld [vmem:[%s3771_s0 + $0xc0] sm:$0xff] }
  0x56   :  { %v100_v29 = vld [vmem:[%s3771_s0 + $0x60] sm:$0xff] }
  0x57   :  { %1895 = vmatmul.mubr.msk.f32.gmra.mrb[2].mxu0 %vm122_vm4, %v89_v7  ;;  %1934 = vmatmul.mubr.msk.f32.gmra.mrb[2].mxu1 %vm122_vm4, %v102_v8  ;;  %v2753_v30 = vld [vmem:[%s3773_s2] ss:$0 sm:$0xff] }
  0x58   :  { %1897 = vmatprep.mubr.msk.f32.mxu0 %vm2470_vm0, %v2471_v1  ;;  %1936 = vmatprep.mubr.msk.f32.mxu1 %vm2470_vm0, %v2471_v1 }
  0x5b   :  { %1898 = vmatmul.mubr.msk.f32.gmra.mrb[4].mxu0 %vm122_vm4, %v90_v9  ;;  %1937 = vmatmul.mubr.msk.f32.gmra.mrb[4].mxu1 %vm122_vm4, %v103_v10 }
  0x5c   :  { %1900 = vmatprep.mubr.msk.f32.mxu0 %vm2470_vm0, %v2471_v1  ;;  %1939 = vmatprep.mubr.msk.f32.mxu1 %vm2470_vm0, %v2471_v1 }
  0x5f   :  { %1901 = vmatmul.mubr.msk.f32.gmra.mrb[6].mxu0 %vm122_vm4, %v91_v11  ;;  %1940 = vmatmul.mubr.msk.f32.gmra.mrb[6].mxu1 %vm122_vm4, %v104_v12 }
  0x60   :  { %1903 = vmatprep.mubr.msk.f32.mxu0 %vm2470_vm0, %v2471_v1  ;;  %1942 = vmatprep.mubr.msk.f32.mxu1 %vm2470_vm0, %v2471_v1 }
  0x63   :  { %1904 = vmatmul.mubr.msk.f32.gmra.mrb[8].mxu0 %vm122_vm4, %v92_v13  ;;  %1943 = vmatmul.mubr.msk.f32.gmra.mrb[8].mxu1 %vm122_vm4, %v105_v14 }
  0x64   :  { %1906 = vmatprep.mubr.msk.f32.mxu0 %vm2470_vm0, %v2471_v1  ;;  %1945 = vmatprep.mubr.msk.f32.mxu1 %vm2470_vm0, %v2471_v1 }
  0x67   :  { %1907 = vmatmul.mubr.msk.f32.gmra.mrb[10].mxu0 %vm122_vm4, %v93_v15  ;;  %1946 = vmatmul.mubr.msk.f32.gmra.mrb[10].mxu1 %vm122_vm4, %v106_v16 }
  0x68   :  { %1909 = vmatprep.mubr.msk.f32.mxu0 %vm2470_vm0, %v2471_v1  ;;  %1948 = vmatprep.mubr.msk.f32.mxu1 %vm2470_vm0, %v2471_v1 }
  0x6b   :  { %1910 = vmatmul.mubr.msk.f32.gmra.mrb[12].mxu0 %vm122_vm4, %v94_v17  ;;  %1949 = vmatmul.mubr.msk.f32.gmra.mrb[12].mxu1 %vm122_vm4, %v107_v18 }
  0x6c   :  { %1912 = vmatprep.mubr.msk.f32.mxu0 %vm2470_vm0, %v2471_v1  ;;  %1951 = vmatprep.mubr.msk.f32.mxu1 %vm2470_vm0, %v2471_v1 }
  0x6f   :  { %1913 = vmatmul.mubr.msk.f32.gmra.mrb[14].mxu0 %vm122_vm4, %v95_v19  ;;  %1952 = vmatmul.mubr.msk.f32.gmra.mrb[14].mxu1 %vm122_vm4, %v108_v20 }
  0x70   :  { %1915 = vmatprep.mubr.msk.f32.mxu0 %vm2470_vm0, %v2471_v1  ;;  %1954 = vmatprep.mubr.msk.f32.mxu1 %vm2470_vm0, %v2471_v1 }
  0x73   :  { %1916 = vmatmul.mubr.msk.f32.gmra.mrb[16].mxu0 %vm122_vm4, %v96_v21  ;;  %1955 = vmatmul.mubr.msk.f32.gmra.mrb[16].mxu1 %vm122_vm4, %v109_v22 }
  0x74   :  { %1918 = vmatprep.mubr.msk.f32.mxu0 %vm2470_vm0, %v2471_v1  ;;  %1957 = vmatprep.mubr.msk.f32.mxu1 %vm2470_vm0, %v2471_v1 }
  0x77   :  { %1919 = vmatmul.mubr.msk.f32.gmra.mrb[18].mxu0 %vm122_vm4, %v97_v23  ;;  %1958 = vmatmul.mubr.msk.f32.gmra.mrb[18].mxu1 %vm122_vm4, %v110_v24 }
  0x78   :  { %1921 = vmatprep.mubr.msk.f32.mxu0 %vm2470_vm0, %v2471_v1  ;;  %1960 = vmatprep.mubr.msk.f32.mxu1 %vm2470_vm0, %v2471_v1 }
  0x7b   :  { %1922 = vmatmul.mubr.msk.f32.gmra.mrb[20].mxu0 %vm122_vm4, %v98_v25  ;;  %1961 = vmatmul.mubr.msk.f32.gmra.mrb[20].mxu1 %vm122_vm4, %v111_v26 }
  0x7c   :  { %1924 = vmatprep.mubr.msk.f32.mxu0 %vm2470_vm0, %v2471_v1  ;;  %1963 = vmatprep.mubr.msk.f32.mxu1 %vm2470_vm0, %v2471_v1 }
  0x7f   :  { %1925 = vmatmul.mubr.msk.f32.gmra.mrb[22].mxu0 %vm122_vm4, %v99_v27  ;;  %1964 = vmatmul.mubr.msk.f32.gmra.mrb[22].mxu1 %vm122_vm4, %v112_v28 }
  0x80   :  { %1927 = vmatprep.mubr.msk.f32.mxu0 %vm2470_vm0, %v2471_v1  ;;  %1998 = vmatprep.mubr.msk.f32.mxu1 %vm2470_vm0, %v2471_v1 }
  0x83   :  { %1928 = vmatmul.mubr.msk.f32.gmra.mrb[24].mxu0 %vm122_vm4, %v100_v29 }
  0x84   :  { %2105 = vmatprep.mubr.msk.f32.mxu0 %vm2470_vm0, %v2471_v1 }
 0x126   :  { %v268_v31 = vpop.f32.mrb[0].mxu0  ;;  %v2755_v32 = vpop.f32.mrb[0].mxu1 }
 0x127   :  { %v269_v33 = vadd.f32 %v2753_v30, %v268_v31  ;;  %v1893_v34 = vpop.f32.mrb[1].mxu0  ;;  %v1932_v35 = vpop.f32.mrb[1].mxu1 }
 0x129   :  { %vm392_vm5 = vcmp.gt.f32.partialorder %v269_v33, 0.0  ;;  %v417_v36 = vmul.f32 0.01, %v269_v33 }
 0x12a   :  { %v273_v37 = vpop.f32.mrb[2].mxu0  ;;  %v2758_v38 = vpop.f32.mrb[2].mxu1 }
 0x12b   :  { %v274_v39 = vadd.f32 %v2753_v30, %v273_v37  ;;  %v1896_v40 = vpop.f32.mrb[3].mxu0  ;;  %v2761_v41 = vsel %vm392_vm5, %v269_v33, %v417_v36  ;;  %v1935_v42 = vpop.f32.mrb[3].mxu1 }
 0x12c   :  { %469 = vadd.xlane.f32.xlu0 %v2761_v41 }
 0x12d   :  { %vm393_vm6 = vcmp.gt.f32.partialorder %v274_v39, 0.0  ;;  %v418_v43 = vmul.f32 0.01, %v274_v39 }
 0x12e   :  { %v278_v44 = vpop.f32.mrb[4].mxu0  ;;  %v2764_v45 = vpop.f32.mrb[4].mxu1 }
 0x12f   :  { %v279_v46 = vadd.f32 %v2753_v30, %v278_v44  ;;  %v1899_v47 = vpop.f32.mrb[5].mxu0  ;;  %v2767_v48 = vsel %vm393_vm6, %v274_v39, %v418_v43  ;;  %v1938_v49 = vpop.f32.mrb[5].mxu1 }
 0x130   :  { %471 = vadd.xlane.f32.xlu0 %v2767_v48 }
 0x131   :  { %vm394_vm7 = vcmp.gt.f32.partialorder %v279_v46, 0.0  ;;  %v419_v50 = vmul.f32 0.01, %v279_v46 }
 0x132   :  { %v283_v51 = vpop.f32.mrb[6].mxu0  ;;  %v2770_v52 = vpop.f32.mrb[6].mxu1 }
 0x133   :  { %v284_v53 = vadd.f32 %v2753_v30, %v283_v51  ;;  %v1902_v54 = vpop.f32.mrb[7].mxu0  ;;  %v2773_v55 = vsel %vm394_vm7, %v279_v46, %v419_v50  ;;  %v1941_v56 = vpop.f32.mrb[7].mxu1 }
 0x134   :  { %473 = vadd.xlane.f32.xlu1 %v2773_v55 }
 0x135   :  { %vm395_vm8 = vcmp.gt.f32.partialorder %v284_v53, 0.0  ;;  %v420_v57 = vmul.f32 0.01, %v284_v53 }
 0x136   :  { %v288_v58 = vpop.f32.mrb[8].mxu0  ;;  %v2776_v59 = vpop.f32.mrb[8].mxu1 }
 0x137   :  { %v289_v60 = vadd.f32 %v2753_v30, %v288_v58  ;;  %v1905_v61 = vpop.f32.mrb[9].mxu0  ;;  %v2779_v62 = vsel %vm395_vm8, %v284_v53, %v420_v57  ;;  %v1944_v63 = vpop.f32.mrb[9].mxu1  ;;  %v334_v53 = vadd.f32 %v2753_v30, %v2755_v32 }
 0x138   :  { %475 = vadd.xlane.f32.xlu1 %v2779_v62 }
 0x139   :  { %vm396_vm9 = vcmp.gt.f32.partialorder %v289_v60, 0.0  ;;  %v421_v2 = vmul.f32 0.01, %v289_v60  ;;  %vm405_vm1 = vcmp.gt.f32.partialorder %v334_v53, 0.0 }
 0x13a   :  { %v293_v3 = vpop.f32.mrb[10].mxu0  ;;  %v2782_v4 = vpop.f32.mrb[10].mxu1 }
 0x13b   :  { %v294_v5 = vadd.f32 %v2753_v30, %v293_v3  ;;  %v1908_v6 = vpop.f32.mrb[11].mxu0  ;;  %v2785_v7 = vsel %vm396_vm9, %v289_v60, %v421_v2  ;;  %v1947_v8 = vpop.f32.mrb[11].mxu1  ;;  %v430_v3 = vmul.f32 0.01, %v334_v53 }
 0x13c   :  { %477 = vadd.xlane.f32.xlu0 %v2785_v7  ;;  %v339_v6 = vadd.f32 %v2753_v30, %v2758_v38  ;;  %v344_v8 = vadd.f32 %v2753_v30, %v2764_v45  ;;  %v349_v45 = vadd.f32 %v2753_v30, %v2770_v52 }
 0x13d   :  { %vm397_vm10 = vcmp.gt.f32.partialorder %v294_v5, 0.0  ;;  %v422_v9 = vmul.f32 0.01, %v294_v5 }
 0x13e   :  { %v298_v10 = vpop.f32.mrb[12].mxu0  ;;  %v2788_v11 = vpop.f32.mrb[12].mxu1  ;;  %vm407_vm3 = vcmp.gt.f32.partialorder %v344_v8, 0.0  ;;  %vm406_vm4 = vcmp.gt.f32.partialorder %v339_v6, 0.0  ;;  %v431_v38 = vmul.f32 0.01, %v339_v6 }
 0x13f   :  { %v299_v12 = vadd.f32 %v2753_v30, %v298_v10  ;;  %v1911_v13 = vpop.f32.mrb[13].mxu0  ;;  %v2791_v14 = vsel %vm397_vm10, %v294_v5, %v422_v9  ;;  %v1950_v15 = vpop.f32.mrb[13].mxu1  ;;  %v364_v52 = vadd.f32 %v2753_v30, %v2788_v11  ;;  %vm408_vm7 = vcmp.gt.f32.partialorder %v349_v45, 0.0 }
 0x140   :  { %479 = vadd.xlane.f32.xlu1 %v2791_v14 }
 0x141   :  { %vm398_vm11 = vcmp.gt.f32.partialorder %v299_v12, 0.0  ;;  %v423_v16 = vmul.f32 0.01, %v299_v12  ;;  %vm411_vm8 = vcmp.gt.f32.partialorder %v364_v52, 0.0 }
 0x142   :  { %v303_v17 = vpop.f32.mrb[14].mxu0  ;;  %v368_v18 = vpop.f32.mrb[14].mxu1 }
 0x143   :  { %v304_v19 = vadd.f32 %v2753_v30, %v303_v17  ;;  %v1914_v20 = vpop.f32.mrb[15].mxu0  ;;  %v2795_v21 = vsel %vm398_vm11, %v299_v12, %v423_v16  ;;  %v2798_v22 = vadd.f32 %v2753_v30, %v368_v18  ;;  %v1953_v23 = vpop.f32.mrb[15].mxu1  ;;  %v2838_v16 = vsel %vm405_vm1, %v334_v53, %v430_v3  ;;  %v839_v53 = vld [vmem:[%s3776_s5 + $0x18] sm:$0xff]  ;;  %v844_v3 = vld [vmem:[%s3776_s5 + $0x40] sm:$0xff] }
 0x144   :  { %481 = vadd.xlane.f32.xlu0 %v2795_v21  ;;  %v432_v17 = vmul.f32 0.01, %v344_v8 }
 0x145   :  { %vm399_vm12 = vcmp.gt.f32.partialorder %v304_v19, 0.0  ;;  %v424_v24 = vmul.f32 0.01, %v304_v19  ;;  %v437_v11 = vmul.f32 0.01, %v2798_v22  ;;  %vm412_vm10 = vcmp.gt.f32.partialorder %v2798_v22, 0.0 }
 0x146   :  { %v308_v25 = vpop.f32.mrb[16].mxu0  ;;  %v373_v26 = vpop.f32.mrb[16].mxu1  ;;  %v2849_v23 = vsel %vm407_vm3, %v344_v8, %v432_v17 }
 0x147   :  { %v309_v27 = vadd.f32 %v2753_v30, %v308_v25  ;;  %v1917_v28 = vpop.f32.mrb[17].mxu0  ;;  %v2802_v29 = vsel %vm399_vm12, %v304_v19, %v424_v24  ;;  %v2805_v31 = vadd.f32 %v2753_v30, %v373_v26  ;;  %v1956_v33 = vpop.f32.mrb[17].mxu1  ;;  %v354_v19 = vadd.f32 %v2753_v30, %v2776_v59 }
 0x148   :  { %483 = vadd.xlane.f32.xlu1 %v2802_v29  ;;  %v2851_v24 = vsel %vm406_vm4, %v339_v6, %v431_v38  ;;  %v359_v25 = vadd.f32 %v2753_v30, %v2782_v4  ;;  %v436_v33 = vmul.f32 0.01, %v364_v52  ;;  %v544_v6 = vlaneseq }
 0x149   :  { %vm400_vm13 = vcmp.gt.f32.partialorder %v309_v27, 0.0  ;;  %v425_v34 = vmul.f32 0.01, %v309_v27  ;;  %v434_v26 = vmul.f32 0.01, %v354_v19  ;;  %vm409_vm6 = vcmp.gt.f32.partialorder %v354_v19, 0.0 }
 0x14a   :  { %v313_v35 = vpop.f32.mrb[18].mxu0  ;;  %v378_v36 = vpop.f32.mrb[18].mxu1  ;;  %vm410_vm9 = vcmp.gt.f32.partialorder %v359_v25, 0.0  ;;  %vm413_vm11 = vcmp.gt.f32.partialorder %v2805_v31, 0.0  ;;  %v2936_v8 = vand.u32 127, %v544_v6 }
 0x14b   :  { %v314_v37 = vadd.f32 %v2753_v30, %v313_v35  ;;  %v1920_v39 = vpop.f32.mrb[19].mxu0  ;;  %v2809_v40 = vsel %vm400_vm13, %v309_v27, %v425_v34  ;;  %v2812_v42 = vadd.f32 %v2753_v30, %v378_v36  ;;  %v1959_v43 = vpop.f32.mrb[19].mxu1  ;;  %v433_v27 = vmul.f32 0.01, %v349_v45 }
 0x14c   :  { %485 = vadd.xlane.f32.xlu0 %v2809_v40  ;;  %v2859_v59 = vsel %vm409_vm6, %v354_v19, %v434_v26  ;;  %v435_v34 = vmul.f32 0.01, %v359_v25  ;;  %v2874_v35 = vsel %vm412_vm10, %v2798_v22, %v437_v11  ;;  %v438_v36 = vmul.f32 0.01, %v2805_v31 }
 0x14d   :  { %vm401_vm14 = vcmp.gt.f32.partialorder %v314_v37, 0.0  ;;  %v426_v44 = vmul.f32 0.01, %v314_v37  ;;  %v2861_v28 = vsel %vm408_vm7, %v349_v45, %v433_v27  ;;  %v439_v39 = vmul.f32 0.01, %v2812_v42 }
 0x14e   :  { %v318_v46 = vpop.f32.mrb[20].mxu0  ;;  %v383_v47 = vpop.f32.mrb[20].mxu1  ;;  %v2867_v4 = vsel %vm410_vm9, %v359_v25, %v435_v34  ;;  %vm414_vm12 = vcmp.gt.f32.partialorder %v2812_v42, 0.0 }
 0x14f   :  { %v319_v49 = vadd.f32 %v2753_v30, %v318_v46  ;;  %v1923_v50 = vpop.f32.mrb[21].mxu0  ;;  %v2816_v51 = vsel %vm401_vm14, %v314_v37, %v426_v44  ;;  %v2821_v54 = vadd.f32 %v2753_v30, %v383_v47  ;;  %v1962_v56 = vpop.f32.mrb[21].mxu1  ;;  %v2880_v37 = vsel %vm413_vm11, %v2805_v31, %v438_v36  ;;  %v837_v47 = vld [vmem:[%s3776_s5 + $0x8] sm:$0xff] }
 0x150   :  { %487 = vadd.xlane.f32.xlu1 %v2816_v51  ;;  %v2886_v43 = vsel %vm414_vm12, %v2812_v42, %v439_v39  ;;  %v836_v42 = vld [vmem:[%s3776_s5] sm:$0xff] }
 0x151   :  { %vm402_vm15 = vcmp.gt.f32.partialorder %v319_v49, 0.0  ;;  %v427_v57 = vmul.f32 0.01, %v319_v49  ;;  %v440_v22 = vmul.f32 0.01, %v2821_v54  ;;  %vm415_vm13 = vcmp.gt.f32.partialorder %v2821_v54, 0.0 }
 0x152   :  { %v323_v58 = vpop.f32.mrb[22].mxu0  ;;  %v388_v60 = vpop.f32.mrb[22].mxu1  ;;  %v2185_v50 = vpack.c.bf16 %v837_v47, %v836_v42  ;;  %v840_v56 = vld [vmem:[%s3776_s5 + $0x20] sm:$0xff] }
 0x153   :  { %v324_v61 = vadd.f32 %v2753_v30, %v323_v58  ;;  %v1926_v63 = vpop.f32.mrb[23].mxu0  ;;  %v2825_v2 = vsel %vm402_vm15, %v319_v49, %v427_v57  ;;  %v2828_v5 = vadd.f32 %v2753_v30, %v388_v60  ;;  %v1965_v32 = vpop.f32.mrb[23].mxu1  ;;  %v2892_v44 = vsel %vm415_vm13, %v2821_v54, %v440_v22  ;;  %v838_v49 = vld [vmem:[%s3776_s5 + $0x10] sm:$0xff]  ;;  %v841_v57 = vld [vmem:[%s3776_s5 + $0x28] sm:$0xff] }
 0x154   :  { %489 = vadd.xlane.f32.xlu0 %v2825_v2  ;;  %2186 = vmatpush3.bf16.msra.mxu1 %v2185_v50  ;;  %v2188_v54 = vpack.c.bf16 %v839_v53, %v838_v49  ;;  %v2191_v58 = vpack.c.bf16 %v841_v57, %v840_v56  ;;  %v842_v60 = vld [vmem:[%s3776_s5 + $0x30] sm:$0xff]  ;;  %vm546_vm15 = vcmp.lt.s32.totalorder %v2936_v8, 50 }
 0x155   :  { %vm403_vm2 = vcmp.gt.f32.partialorder %v324_v61, 0.0  ;;  %v428_v9 = vmul.f32 0.01, %v324_v61  ;;  %v441_v31 = vmul.f32 0.01, %v2828_v5  ;;  %vm416_vm14 = vcmp.gt.f32.partialorder %v2828_v5, 0.0  ;;  %2187 = vmatprep.subr.bf16.mxu1 %v2469_v0 }
 0x156   :  { %v328_v10 = vpop.f32.mrb[24].mxu0 }
 0x157   :  { %v329_v12 = vadd.f32 %v2753_v30, %v328_v10  ;;  %v1929_v13 = vpop.f32.mrb[25].mxu0  ;;  %v2836_v15 = vsel %vm403_vm2, %v324_v61, %v428_v9  ;;  %v2865_v30 = vsel %vm411_vm8, %v364_v52, %v436_v33  ;;  %v2898_v46 = vsel %vm416_vm14, %v2828_v5, %v441_v31  ;;  %v843_v61 = vld [vmem:[%s3776_s5 + $0x38] sm:$0xff]  ;;  %v845_v5 = vld [vmem:[%s3776_s5 + $0x48] sm:$0xff] }
 0x158   :  { %491 = vadd.xlane.f32.xlu1 %v2836_v15  ;;  %2189 = vmatpush3.bf16.msra.mxu1 %v2188_v54  ;;  %v2194_v63 = vpack.c.bf16 %v843_v61, %v842_v60  ;;  %v2197_v32 = vpack.c.bf16 %v845_v5, %v844_v3 }
 0x159   :  { %vm404_vm5 = vcmp.gt.f32.partialorder %v329_v12, 0.0  ;;  %v429_v18 = vmul.f32 0.01, %v329_v12  ;;  %2190 = vmatprep.subr.bf16.mxu1 %v2469_v0 }
 0x15b   :  { %v2845_v20 = vsel %vm404_vm5, %v329_v12, %v429_v18 }
 0x15c   :  { %495 = vadd.xlane.f32.xlu1 %v2838_v16  ;;  %493 = vadd.xlane.f32.xlu0 %v2845_v20 }
 0x15d   :  { %2192 = vmatpush3.bf16.msra.mxu1 %v2191_v58 }
 0x15e   :  { %2193 = vmatprep.subr.bf16.mxu1 %v2469_v0 }
 0x160   :  { %499 = vadd.xlane.f32.xlu1 %v2849_v23  ;;  %497 = vadd.xlane.f32.xlu0 %v2851_v24 }
 0x161   :  { %2195 = vmatpush3.bf16.msra.mxu1 %v2194_v63  ;;  %v847_v63 = vld [vmem:[%s3776_s5 + $0x58] sm:$0xff] }
 0x162   :  { %2196 = vmatprep.subr.bf16.mxu1 %v2469_v0 }
 0x164   :  { %503 = vadd.xlane.f32.xlu1 %v2859_v59  ;;  %501 = vadd.xlane.f32.xlu0 %v2861_v28 }
 0x165   :  { %2198 = vmatpush3.bf16.msra.mxu1 %v2197_v32 }
 0x166   :  { %2199 = vmatprep.subr.bf16.mxu1 %v2469_v0 }
 0x168   :  { %507 = vadd.xlane.f32.xlu1 %v2865_v30  ;;  %505 = vadd.xlane.f32.xlu0 %v2867_v4 }
 0x16c   :  { %509 = vadd.xlane.f32.xlu1 %v2874_v35 }
 0x170   :  { %511 = vadd.xlane.f32.xlu1 %v2880_v37 }
 0x174   :  { %513 = vadd.xlane.f32.xlu1 %v2886_v43 }
 0x178   :  { %515 = vadd.xlane.f32.xlu1 %v2892_v44 }
 0x17c   :  { %517 = vadd.xlane.f32.xlu1 %v2898_v46 }
 0x1b9   :  { %v470_v9 = vpop.xlane.xlu0 %469 }
 0x1ba   :  { %v519_v10 = vmul.f32 0.02, %v470_v9 }
 0x1bc   :  { %v547_v12 = vsub.f32 %v2761_v41, %v519_v10  ;;  %v848_v10 = vld [vmem:[%s3776_s5 + $0x60] sm:$0xff] }
 0x1bd   :  { %v472_v13 = vpop.xlane.xlu0 %471 }
 0x1be   :  { %v520_v17 = vmul.f32 0.02, %v472_v13  ;;  %v2942_v38 = vsel %vm546_vm15, %v547_v12, 0.0  ;;  %v849_v12 = vld [vmem:[%s3776_s5 + $0x68] sm:$0xff] }
 0x1bf   :  { %v599_v45 = vmul.f32 %v2942_v38, %v2942_v38  ;;  %v2203_v13 = vpack.c.bf16 %v849_v12, %v848_v10 }
 0x1c0   :  { %v548_v18 = vsub.f32 %v2767_v48, %v520_v17 }
 0x1c1   :  { %v474_v19 = vpop.xlane.xlu1 %473  ;;  %624 = vadd.xlane.f32.xlu0 %v599_v45 }
 0x1c2   :  { %v521_v25 = vmul.f32 0.02, %v474_v19  ;;  %v2949_v52 = vsel %vm546_vm15, %v548_v18, 0.0 }
 0x1c3   :  { %v600_v41 = vmul.f32 %v2949_v52, %v2949_v52 }
 0x1c4   :  { %v549_v26 = vsub.f32 %v2773_v55, %v521_v25  ;;  %v850_v25 = vld [vmem:[%s3776_s5 + $0x70] sm:$0xff] }
 0x1c5   :  { %v476_v27 = vpop.xlane.xlu1 %475  ;;  %626 = vadd.xlane.f32.xlu0 %v600_v41  ;;  %v851_v41 = vld [vmem:[%s3776_s5 + $0x78] sm:$0xff] }
 0x1c6   :  { %v522_v33 = vmul.f32 0.02, %v476_v27  ;;  %v2956_v34 = vsel %vm546_vm15, %v549_v26, 0.0  ;;  %v2206_v26 = vpack.c.bf16 %v851_v41, %v850_v25 }
 0x1c7   :  { %v601_v48 = vmul.f32 %v2956_v34, %v2956_v34 }
 0x1c8   :  { %v550_v11 = vsub.f32 %v2779_v62, %v522_v33 }
 0x1c9   :  { %v478_v36 = vpop.xlane.xlu0 %477  ;;  %628 = vadd.xlane.f32.xlu0 %v601_v48 }
 0x1ca   :  { %v523_v39 = vmul.f32 0.02, %v478_v36  ;;  %v2963_v22 = vsel %vm546_vm15, %v550_v11, 0.0 }
 0x1cb   :  { %v602_v55 = vmul.f32 %v2963_v22, %v2963_v22 }
 0x1cc   :  { %v551_v31 = vsub.f32 %v2785_v7, %v523_v39 }
 0x1cd   :  { %v480_v42 = vpop.xlane.xlu1 %479  ;;  %630 = vadd.xlane.f32.xlu0 %v602_v55 }
 0x1ce   :  { %v524_v47 = vmul.f32 0.02, %v480_v42  ;;  %v2970_v49 = vsel %vm546_vm15, %v551_v31, 0.0 }
 0x1cf   :  { %v603_v62 = vmul.f32 %v2970_v49, %v2970_v49 }
 0x1d0   :  { %v552_v50 = vsub.f32 %v2791_v14, %v524_v47  ;;  %v846_v14 = vld [vmem:[%s3776_s5 + $0x50] sm:$0xff] }
 0x1d1   :  { %v482_v53 = vpop.xlane.xlu0 %481  ;;  %632 = vadd.xlane.f32.xlu0 %v603_v62  ;;  %v2200_v5 = vpack.c.bf16 %v847_v63, %v846_v14 }
 0x1d2   :  { %v525_v54 = vmul.f32 0.02, %v482_v53  ;;  %v2977_v56 = vsel %vm546_vm15, %v552_v50, 0.0 }
 0x1d3   :  { %v604_v7 = vmul.f32 %v2977_v56, %v2977_v56  ;;  %2201 = vmatpush3.bf16.msra.mxu1 %v2200_v5 }
 0x1d4   :  { %v553_v57 = vsub.f32 %v2795_v21, %v525_v54  ;;  %2202 = vmatprep.subr.bf16.mxu1 %v2469_v0 }
 0x1d5   :  { %v484_v58 = vpop.xlane.xlu1 %483  ;;  %634 = vadd.xlane.f32.xlu0 %v604_v7 }
 0x1d6   :  { %v526_v60 = vmul.f32 0.02, %v484_v58  ;;  %v2984_v61 = vsel %vm546_vm15, %v553_v57, 0.0 }
 0x1d7   :  { %v605_v3 = vmul.f32 %v2984_v61, %v2984_v61  ;;  %2204 = vmatpush3.bf16.msra.mxu1 %v2203_v13 }
 0x1d8   :  { %v554_v21 = vsub.f32 %v2802_v29, %v526_v60  ;;  %2205 = vmatprep.subr.bf16.mxu1 %v2469_v0 }
 0x1d9   :  { %v486_v32 = vpop.xlane.xlu0 %485  ;;  %636 = vadd.xlane.f32.xlu1 %v605_v3 }
 0x1da   :  { %v527_v6 = vmul.f32 0.02, %v486_v32  ;;  %v2997_v9 = vsel %vm546_vm15, %v554_v21, 0.0 }
 0x1db   :  { %v606_v29 = vmul.f32 %v2997_v9, %v2997_v9  ;;  %2207 = vmatpush3.bf16.msra.mxu1 %v2206_v26 }
 0x1dc   :  { %v555_v17 = vsub.f32 %v2809_v40, %v527_v6 }
 0x1dd   :  { %v488_v45 = vpop.xlane.xlu1 %487  ;;  %638 = vadd.xlane.f32.xlu0 %v606_v29 }
 0x1de   :  { %v528_v18 = vmul.f32 0.02, %v488_v45  ;;  %v3011_v19 = vsel %vm546_vm15, %v555_v17, 0.0 }
 0x1df   :  { %v607_v40 = vmul.f32 %v3011_v19, %v3011_v19 }
 0x1e0   :  { %v556_v27 = vsub.f32 %v2816_v51, %v528_v18 }
 0x1e1   :  { %v490_v33 = vpop.xlane.xlu0 %489  ;;  %640 = vadd.xlane.f32.xlu1 %v607_v40 }
 0x1e2   :  { %v529_v48 = vmul.f32 0.02, %v490_v33  ;;  %v3025_v11 = vsel %vm546_vm15, %v556_v27, 0.0 }
 0x1e3   :  { %v608_v36 = vmul.f32 %v3025_v11, %v3025_v11 }
 0x1e4   :  { %v557_v39 = vsub.f32 %v2825_v2, %v529_v48 }
 0x1e5   :  { %v492_v55 = vpop.xlane.xlu1 %491  ;;  %642 = vadd.xlane.f32.xlu0 %v608_v36 }
 0x1e6   :  { %v530_v31 = vmul.f32 0.02, %v492_v55  ;;  %v3032_v42 = vsel %vm546_vm15, %v557_v39, 0.0 }
 0x1e7   :  { %v609_v51 = vmul.f32 %v3032_v42, %v3032_v42 }
 0x1e8   :  { %v558_v47 = vsub.f32 %v2836_v15, %v530_v31 }
 0x1e9   :  { %644 = vadd.xlane.f32.xlu1 %v609_v51  ;;  %v496_v62 = vpop.xlane.xlu1 %495  ;;  %v494_v50 = vpop.xlane.xlu0 %493 }
 0x1ea   :  { %v532_v53 = vmul.f32 0.02, %v496_v62  ;;  %v531_v54 = vmul.f32 0.02, %v494_v50  ;;  %v3039_v2 = vsel %vm546_vm15, %v558_v47, 0.0 }
 0x1eb   :  { %v610_v7 = vmul.f32 %v3039_v2, %v3039_v2 }
 0x1ec   :  { %v560_v57 = vsub.f32 %v2838_v16, %v532_v53  ;;  %v559_v58 = vsub.f32 %v2845_v20, %v531_v54 }
 0x1ed   :  { %v500_v60 = vpop.xlane.xlu1 %499  ;;  %646 = vadd.xlane.f32.xlu0 %v610_v7  ;;  %v498_v14 = vpop.xlane.xlu0 %497 }
 0x1ee   :  { %v534_v15 = vmul.f32 0.02, %v500_v60  ;;  %v533_v63 = vmul.f32 0.02, %v498_v14  ;;  %v3047_v3 = vsel %vm546_vm15, %v560_v57, 0.0  ;;  %v3051_v5 = vsel %vm546_vm15, %v559_v58, 0.0 }
 0x1ef   :  { %v612_v21 = vmul.f32 %v3047_v3, %v3047_v3  ;;  %v611_v16 = vmul.f32 %v3051_v5, %v3051_v5 }
 0x1f0   :  { %v562_v20 = vsub.f32 %v2849_v23, %v534_v15  ;;  %v561_v32 = vsub.f32 %v2851_v24, %v533_v63 }
 0x1f1   :  { %v504_v6 = vpop.xlane.xlu1 %503  ;;  %650 = vadd.xlane.f32.xlu0 %v612_v21  ;;  %648 = vadd.xlane.f32.xlu1 %v611_v16  ;;  %v502_v10 = vpop.xlane.xlu0 %501 }
 0x1f2   :  { %v536_v12 = vmul.f32 0.02, %v504_v6  ;;  %v535_v29 = vmul.f32 0.02, %v502_v10  ;;  %v3061_v13 = vsel %vm546_vm15, %v562_v20, 0.0  ;;  %v3065_v17 = vsel %vm546_vm15, %v561_v32, 0.0 }
 0x1f3   :  { %v614_v45 = vmul.f32 %v3061_v13, %v3061_v13  ;;  %v613_v23 = vmul.f32 %v3065_v17, %v3065_v17 }
 0x1f4   :  { %v564_v24 = vsub.f32 %v2859_v59, %v536_v12  ;;  %v563_v18 = vsub.f32 %v2861_v28, %v535_v29 }
 0x1f5   :  { %v508_v25 = vpop.xlane.xlu1 %507  ;;  %654 = vadd.xlane.f32.xlu0 %v614_v45  ;;  %652 = vadd.xlane.f32.xlu1 %v613_v23  ;;  %v506_v41 = vpop.xlane.xlu0 %505 }
 0x1f6   :  { %v538_v40 = vmul.f32 0.02, %v508_v25  ;;  %v537_v26 = vmul.f32 0.02, %v506_v41  ;;  %v3075_v27 = vsel %vm546_vm15, %v564_v24, 0.0  ;;  %v3079_v33 = vsel %vm546_vm15, %v563_v18, 0.0 }
 0x1f7   :  { %v616_v48 = vmul.f32 %v3075_v27, %v3075_v27  ;;  %v615_v59 = vmul.f32 %v3079_v33, %v3079_v33 }
 0x1f8   :  { %v566_v28 = vsub.f32 %v2865_v30, %v538_v40  ;;  %v565_v36 = vsub.f32 %v2867_v4, %v537_v26 }
 0x1f9   :  { %v510_v39 = vpop.xlane.xlu1 %509  ;;  %658 = vadd.xlane.f32.xlu0 %v616_v48  ;;  %656 = vadd.xlane.f32.xlu1 %v615_v59 }
 0x1fa   :  { %v539_v55 = vmul.f32 0.02, %v510_v39  ;;  %v3089_v31 = vsel %vm546_vm15, %v566_v28, 0.0  ;;  %v3093_v51 = vsel %vm546_vm15, %v565_v36, 0.0  ;;  %v3137_v36 = vld [vmem:[%s3774_s3] ss:$0 sm:$0xff] }
 0x1fb   :  { %v618_v47 = vmul.f32 %v3089_v31, %v3089_v31  ;;  %v617_v30 = vmul.f32 %v3093_v51, %v3093_v51 }
 0x1fc   :  { %v567_v4 = vsub.f32 %v2874_v35, %v539_v55 }
 0x1fd   :  { %v512_v62 = vpop.xlane.xlu1 %511  ;;  %662 = vadd.xlane.f32.xlu0 %v618_v47  ;;  %660 = vadd.xlane.f32.xlu1 %v617_v30  ;;  %v3140_v30 = vld [vmem:[#allocation5] ss:$0 sm:$0xff] }
 0x1fe   :  { %v540_v50 = vmul.f32 0.02, %v512_v62  ;;  %v3102_v53 = vsel %vm546_vm15, %v567_v4, 0.0 }
 0x1ff   :  { %v619_v54 = vmul.f32 %v3102_v53, %v3102_v53 }
 0x200   :  { %v568_v7 = vsub.f32 %v2880_v37, %v540_v50 }
 0x201   :  { %v514_v57 = vpop.xlane.xlu1 %513  ;;  %664 = vadd.xlane.f32.xlu1 %v619_v54 }
 0x202   :  { %v541_v58 = vmul.f32 0.02, %v514_v57  ;;  %v3109_v60 = vsel %vm546_vm15, %v568_v7, 0.0 }
 0x203   :  { %v620_v35 = vmul.f32 %v3109_v60, %v3109_v60 }
 0x204   :  { %v569_v14 = vsub.f32 %v2886_v43, %v541_v58 }
 0x205   :  { %v516_v15 = vpop.xlane.xlu1 %515  ;;  %666 = vadd.xlane.f32.xlu0 %v620_v35 }
 0x206   :  { %v542_v63 = vmul.f32 0.02, %v516_v15  ;;  %v3116_v21 = vsel %vm546_vm15, %v569_v14, 0.0 }
 0x207   :  { %v621_v37 = vmul.f32 %v3116_v21, %v3116_v21 }
 0x208   :  { %v570_v16 = vsub.f32 %v2892_v44, %v542_v63 }
 0x209   :  { %v518_v20 = vpop.xlane.xlu1 %517  ;;  %668 = vadd.xlane.f32.xlu1 %v621_v37 }
 0x20a   :  { %v543_v32 = vmul.f32 0.02, %v518_v20  ;;  %v3123_v6 = vsel %vm546_vm15, %v570_v16, 0.0 }
 0x20b   :  { %v622_v43 = vmul.f32 %v3123_v6, %v3123_v6 }
 0x20c   :  { %v571_v10 = vsub.f32 %v2898_v46, %v543_v32 }
 0x20d   :  { %670 = vadd.xlane.f32.xlu0 %v622_v43 }
 0x20e   :  { %v3130_v12 = vsel %vm546_vm15, %v571_v10, 0.0 }
 0x20f   :  { %v623_v44 = vmul.f32 %v3130_v12, %v3130_v12 }
 0x211   :  { %672 = vadd.xlane.f32.xlu1 %v623_v44 }
 0x24e   :  { %v625_v29 = vpop.xlane.xlu0 %624 }
 0x24f   :  { %v674_v45 = vmul.f32 0.02, %v625_v29 }
 0x251   :  { %v699_v23 = vadd.f32 1e-05, %v674_v45 }
 0x252   :  { %v627_v24 = vpop.xlane.xlu0 %626 }
 0x253   :  { %2245 = vrsqrt.f32 %v699_v23  ;;  %v675_v18 = vmul.f32 0.02, %v627_v24 }
 0x255   :  { %v700_v25 = vadd.f32 1e-05, %v675_v18 }
 0x256   :  { %v629_v41 = vpop.xlane.xlu0 %628 }
 0x257   :  { %2247 = vrsqrt.f32 %v700_v25  ;;  %v676_v40 = vmul.f32 0.02, %v629_v41 }
 0x259   :  { %v701_v46 = vadd.f32 1e-05, %v676_v40 }
 0x25a   :  { %v631_v26 = vpop.xlane.xlu0 %630 }
 0x25b   :  { %2249 = vrsqrt.f32 %v701_v46  ;;  %v677_v48 = vmul.f32 0.02, %v631_v26 }
 0x25d   :  { %v2246_v59 = vpop.eup %2245  ;;  %v702_v28 = vadd.f32 1e-05, %v677_v48 }
 0x25e   :  { %v749_v39 = vmul.f32 %v2246_v59, %v2942_v38  ;;  %v633_v55 = vpop.xlane.xlu0 %632 }
 0x25f   :  { %2251 = vrsqrt.f32 %v702_v28  ;;  %v678_v47 = vmul.f32 0.02, %v633_v55 }
 0x260   :  { %v780_v4 = vmul.f32 %v3137_v36, %v749_v39 }
 0x261   :  { %v2248_v62 = vpop.eup %2247  ;;  %v703_v50 = vadd.f32 1e-05, %v678_v47 }
 0x262   :  { %v635_v54 = vpop.xlane.xlu0 %634  ;;  %v811_v7 = vadd.f32 %v3140_v30, %v780_v4  ;;  %v750_v57 = vmul.f32 %v2248_v62, %v2949_v52 }
 0x263   :  { %2253 = vrsqrt.f32 %v703_v50  ;;  %v679_v58 = vmul.f32 0.02, %v635_v54 }
 0x264   :  { %1999 = vmatmul.mubr.f32.vlgmr.msra.gmra.mrb[24].mxu1 %v811_v7  ;;  %v781_v35 = vmul.f32 %v3137_v36, %v750_v57 }
 0x265   :  { %v2250_v38 = vpop.eup %2249  ;;  %v704_v14 = vadd.f32 1e-05, %v679_v58  ;;  %2001 = vmatprep.mubr.msk.f32.mxu1 %vm2470_vm0, %v2471_v1 }
 0x266   :  { %v637_v15 = vpop.xlane.xlu1 %636  ;;  %v812_v63 = vadd.f32 %v3140_v30, %v781_v35  ;;  %v751_v37 = vmul.f32 %v2250_v38, %v2956_v34 }
 0x267   :  { %2255 = vrsqrt.f32 %v704_v14  ;;  %v680_v16 = vmul.f32 0.02, %v637_v15 }
 0x268   :  { %2002 = vmatmul.mubr.f32.gmra.mrb[26].mxu1 %v812_v63  ;;  %v782_v52 = vmul.f32 %v3137_v36, %v751_v37 }
 0x269   :  { %v2252_v20 = vpop.eup %2251  ;;  %v705_v32 = vadd.f32 1e-05, %v680_v16  ;;  %2004 = vmatprep.mubr.msk.f32.mxu1 %vm2470_vm0, %v2471_v1 }
 0x26a   :  { %v639_v43 = vpop.xlane.xlu0 %638  ;;  %v813_v10 = vadd.f32 %v3140_v30, %v782_v52  ;;  %v752_v44 = vmul.f32 %v2252_v20, %v2963_v22 }
 0x26b   :  { %2257 = vrsqrt.f32 %v705_v32  ;;  %v681_v29 = vmul.f32 0.02, %v639_v43 }
 0x26c   :  { %2005 = vmatmul.mubr.f32.gmra.mrb[28].mxu1 %v813_v10  ;;  %v783_v34 = vmul.f32 %v3137_v36, %v752_v44 }
 0x26d   :  { %v2254_v45 = vpop.eup %2253  ;;  %v706_v23 = vadd.f32 1e-05, %v681_v29  ;;  %2007 = vmatprep.mubr.msk.f32.mxu1 %vm2470_vm0, %v2471_v1 }
 0x26e   :  { %v641_v24 = vpop.xlane.xlu1 %640  ;;  %v814_v18 = vadd.f32 %v3140_v30, %v783_v34  ;;  %v753_v25 = vmul.f32 %v2254_v45, %v2970_v49 }
 0x26f   :  { %2259 = vrsqrt.f32 %v706_v23  ;;  %v682_v41 = vmul.f32 0.02, %v641_v24 }
 0x270   :  { %2008 = vmatmul.mubr.f32.gmra.mrb[30].mxu1 %v814_v18  ;;  %v784_v22 = vmul.f32 %v3137_v36, %v753_v25 }
 0x271   :  { %v2256_v40 = vpop.eup %2255  ;;  %v707_v46 = vadd.f32 1e-05, %v682_v41  ;;  %2010 = vmatprep.mubr.msk.f32.mxu1 %vm2470_vm0, %v2471_v1 }
 0x272   :  { %v643_v26 = vpop.xlane.xlu0 %642  ;;  %v815_v48 = vadd.f32 %v3140_v30, %v784_v22  ;;  %v754_v59 = vmul.f32 %v2256_v40, %v2977_v56 }
 0x273   :  { %2261 = vrsqrt.f32 %v707_v46  ;;  %v683_v28 = vmul.f32 0.02, %v643_v26 }
 0x274   :  { %2011 = vmatmul.mubr.f32.gmra.mrb[32].mxu1 %v815_v48  ;;  %v785_v49 = vmul.f32 %v3137_v36, %v754_v59 }
 0x275   :  { %v2258_v39 = vpop.eup %2257  ;;  %v708_v55 = vadd.f32 1e-05, %v683_v28  ;;  %2013 = vmatprep.mubr.msk.f32.mxu1 %vm2470_vm0, %v2471_v1 }
 0x276   :  { %v645_v47 = vpop.xlane.xlu1 %644  ;;  %v816_v4 = vadd.f32 %v3140_v30, %v785_v49  ;;  %v755_v62 = vmul.f32 %v2258_v39, %v2984_v61 }
 0x277   :  { %2263 = vrsqrt.f32 %v708_v55  ;;  %v684_v50 = vmul.f32 0.02, %v645_v47 }
 0x278   :  { %2014 = vmatmul.mubr.f32.gmra.mrb[34].mxu1 %v816_v4  ;;  %v786_v56 = vmul.f32 %v3137_v36, %v755_v62 }
 0x279   :  { %v2260_v54 = vpop.eup %2259  ;;  %v709_v7 = vadd.f32 1e-05, %v684_v50  ;;  %2016 = vmatprep.mubr.msk.f32.mxu1 %vm2470_vm0, %v2471_v1 }
 0x27a   :  { %v647_v57 = vpop.xlane.xlu0 %646  ;;  %v817_v58 = vadd.f32 %v3140_v30, %v786_v56  ;;  %v756_v35 = vmul.f32 %v2260_v54, %v2997_v9 }
 0x27b   :  { %2265 = vrsqrt.f32 %v709_v7  ;;  %v685_v38 = vmul.f32 0.02, %v647_v57 }
 0x27c   :  { %2017 = vmatmul.mubr.f32.gmra.mrb[36].mxu1 %v817_v58  ;;  %v787_v61 = vmul.f32 %v3137_v36, %v756_v35 }
 0x27d   :  { %v2262_v14 = vpop.eup %2261  ;;  %v710_v15 = vadd.f32 1e-05, %v685_v38  ;;  %2019 = vmatprep.mubr.msk.f32.mxu1 %vm2470_vm0, %v2471_v1 }
 0x27e   :  { %v649_v63 = vpop.xlane.xlu1 %648  ;;  %v651_v37 = vpop.xlane.xlu0 %650  ;;  %v818_v16 = vadd.f32 %v3140_v30, %v787_v61  ;;  %v757_v52 = vmul.f32 %v2262_v14, %v3011_v19 }
 0x27f   :  { %2267 = vrsqrt.f32 %v710_v15  ;;  %v686_v20 = vmul.f32 0.02, %v649_v63  ;;  %v687_v32 = vmul.f32 0.02, %v651_v37 }
 0x280   :  { %2020 = vmatmul.mubr.f32.gmra.mrb[38].mxu1 %v818_v16  ;;  %v788_v9 = vmul.f32 %v3137_v36, %v757_v52 }
 0x281   :  { %v2264_v43 = vpop.eup %2263  ;;  %v711_v10 = vadd.f32 1e-05, %v686_v20  ;;  %v712_v44 = vadd.f32 1e-05, %v687_v32  ;;  %2022 = vmatprep.mubr.msk.f32.mxu1 %vm2470_vm0, %v2471_v1 }
 0x282   :  { %v653_v29 = vpop.xlane.xlu1 %652  ;;  %v655_v34 = vpop.xlane.xlu0 %654  ;;  %v819_v45 = vadd.f32 %v3140_v30, %v788_v9  ;;  %v758_v23 = vmul.f32 %v2264_v43, %v3025_v11 }
 0x283   :  { %2269 = vrsqrt.f32 %v711_v10  ;;  %v688_v19 = vmul.f32 0.02, %v653_v29  ;;  %v689_v24 = vmul.f32 0.02, %v655_v34 }
 0x284   :  { %2271 = vrsqrt.f32 %v712_v44  ;;  %2023 = vmatmul.mubr.f32.gmra.mrb[40].mxu1 %v819_v45  ;;  %v789_v18 = vmul.f32 %v3137_v36, %v758_v23 }
 0x285   :  { %v2266_v25 = vpop.eup %2265  ;;  %v713_v41 = vadd.f32 1e-05, %v688_v19  ;;  %v714_v22 = vadd.f32 1e-05, %v689_v24  ;;  %2025 = vmatprep.mubr.msk.f32.mxu1 %vm2470_vm0, %v2471_v1 }
 0x286   :  { %v657_v40 = vpop.xlane.xlu1 %656  ;;  %v659_v46 = vpop.xlane.xlu0 %658  ;;  %v820_v26 = vadd.f32 %v3140_v30, %v789_v18  ;;  %v759_v48 = vmul.f32 %v2266_v25, %v3032_v42 }
 0x287   :  { %2273 = vrsqrt.f32 %v713_v41  ;;  %v690_v11 = vmul.f32 0.02, %v657_v40  ;;  %v691_v39 = vmul.f32 0.02, %v659_v46 }
 0x288   :  { %2026 = vmatmul.mubr.f32.gmra.mrb[42].mxu1 %v820_v26  ;;  %v790_v59 = vmul.f32 %v3137_v36, %v759_v48  ;;  %2275 = vrsqrt.f32 %v714_v22 }
 0x289   :  { %v2268_v28 = vpop.eup %2267  ;;  %v715_v49 = vadd.f32 1e-05, %v690_v11  ;;  %2028 = vmatprep.mubr.msk.f32.mxu1 %vm2470_vm0, %v2471_v1  ;;  %v716_v50 = vadd.f32 1e-05, %v691_v39 }
 0x28a   :  { %v661_v55 = vpop.xlane.xlu1 %660  ;;  %v821_v47 = vadd.f32 %v3140_v30, %v790_v59  ;;  %v760_v4 = vmul.f32 %v2268_v28, %v3039_v2  ;;  %v663_v7 = vpop.xlane.xlu0 %662 }
 0x28b   :  { %2277 = vrsqrt.f32 %v715_v49  ;;  %v692_v56 = vmul.f32 0.02, %v661_v55  ;;  %v693_v14 = vmul.f32 0.02, %v663_v7 }
 0x28c   :  { %2029 = vmatmul.mubr.f32.gmra.mrb[44].mxu1 %v821_v47  ;;  %v791_v42 = vmul.f32 %v3137_v36, %v760_v4  ;;  %2279 = vrsqrt.f32 %v716_v50 }
 0x28d   :  { %v2270_v62 = vpop.eup %2269  ;;  %2031 = vmatprep.mubr.msk.f32.mxu1 %vm2470_vm0, %v2471_v1  ;;  %v717_v61 = vadd.f32 1e-05, %v692_v56 }
 0x28e   :  { %v2272_v54 = vpop.eup %2271  ;;  %v822_v57 = vadd.f32 %v3140_v30, %v791_v42  ;;  %v761_v58 = vmul.f32 %v2270_v62, %v3051_v5  ;;  %v665_v15 = vpop.xlane.xlu1 %664 }
 0x28f   :  { %v762_v35 = vmul.f32 %v2272_v54, %v3047_v3  ;;  %2281 = vrsqrt.f32 %v717_v61  ;;  %v718_v3 = vadd.f32 1e-05, %v693_v14  ;;  %v694_v52 = vmul.f32 0.02, %v665_v15 }
 0x290   :  { %2032 = vmatmul.mubr.f32.gmra.mrb[46].mxu1 %v822_v57  ;;  %v792_v2 = vmul.f32 %v3137_v36, %v761_v58 }
 0x291   :  { %v2274_v38 = vpop.eup %2273  ;;  %2034 = vmatprep.mubr.msk.f32.mxu1 %vm2470_vm0, %v2471_v1  ;;  %v793_v37 = vmul.f32 %v3137_v36, %v762_v35  ;;  %2283 = vrsqrt.f32 %v718_v3  ;;  %v719_v44 = vadd.f32 1e-05, %v694_v52 }
 0x292   :  { %v823_v63 = vadd.f32 %v3140_v30, %v792_v2  ;;  %v763_v16 = vmul.f32 %v2274_v38, %v3065_v17  ;;  %v2276_v5 = vpop.eup %2275  ;;  %v667_v20 = vpop.xlane.xlu0 %666 }
 0x293   :  { %v824_v32 = vadd.f32 %v3140_v30, %v793_v37  ;;  %v764_v43 = vmul.f32 %v2276_v5, %v3061_v13  ;;  %v695_v17 = vmul.f32 0.02, %v667_v20  ;;  %2285 = vrsqrt.f32 %v719_v44  ;;  %v3264_v5 = vld [vmem:[#allocation7] ss:$0 sm:$0xff] }
 0x294   :  { %2035 = vmatmul.mubr.f32.gmra.mrb[48].mxu1 %v823_v63  ;;  %v794_v9 = vmul.f32 %v3137_v36, %v763_v16 }
 0x295   :  { %2037 = vmatprep.mubr.msk.f32.mxu1 %vm2470_vm0, %v2471_v1  ;;  %v2278_v10 = vpop.eup %2277  ;;  %v795_v45 = vmul.f32 %v3137_v36, %v764_v43  ;;  %v720_v24 = vadd.f32 1e-05, %v695_v17 }
 0x296   :  { %v669_v29 = vpop.xlane.xlu1 %668  ;;  %v825_v34 = vadd.f32 %v3140_v30, %v794_v9  ;;  %v765_v23 = vmul.f32 %v2278_v10, %v3079_v33  ;;  %v2280_v19 = vpop.eup %2279 }
 0x297   :  { %v696_v13 = vmul.f32 0.02, %v669_v29  ;;  %v826_v25 = vadd.f32 %v3140_v30, %v795_v45  ;;  %v766_v22 = vmul.f32 %v2280_v19, %v3075_v27  ;;  %2287 = vrsqrt.f32 %v720_v24 }
 0x298   :  { %2038 = vmatmul.mubr.f32.gmra.mrb[50].mxu1 %v824_v32  ;;  %v796_v41 = vmul.f32 %v3137_v36, %v765_v23 }
 0x299   :  { %2040 = vmatprep.mubr.msk.f32.mxu1 %vm2470_vm0, %v2471_v1  ;;  %v2282_v40 = vpop.eup %2281  ;;  %v721_v46 = vadd.f32 1e-05, %v696_v13  ;;  %v797_v11 = vmul.f32 %v3137_v36, %v766_v22 }
 0x29a   :  { %v671_v18 = vpop.xlane.xlu0 %670  ;;  %v827_v48 = vadd.f32 %v3140_v30, %v796_v41  ;;  %v767_v59 = vmul.f32 %v2282_v40, %v3093_v51 }
 0x29b   :  { %v697_v33 = vmul.f32 0.02, %v671_v18  ;;  %v2284_v28 = vpop.eup %2283  ;;  %2289 = vrsqrt.f32 %v721_v46  ;;  %v828_v39 = vadd.f32 %v3140_v30, %v797_v11 }
 0x29c   :  { %2041 = vmatmul.mubr.f32.gmra.mrb[52].mxu1 %v825_v34  ;;  %v798_v55 = vmul.f32 %v3137_v36, %v767_v59  ;;  %v768_v47 = vmul.f32 %v2284_v28, %v3089_v31 }
 0x29d   :  { %2043 = vmatprep.mubr.msk.f32.mxu1 %vm2470_vm0, %v2471_v1  ;;  %v722_v49 = vadd.f32 1e-05, %v697_v33  ;;  %v2286_v4 = vpop.eup %2285 }
 0x29e   :  { %v673_v26 = vpop.xlane.xlu1 %672  ;;  %v829_v51 = vadd.f32 %v3140_v30, %v798_v55  ;;  %v799_v62 = vmul.f32 %v3137_v36, %v768_v47  ;;  %v769_v50 = vmul.f32 %v2286_v4, %v3102_v53 }
 0x29f   :  { %v698_v27 = vmul.f32 0.02, %v673_v26  ;;  %2291 = vrsqrt.f32 %v722_v49 }
 0x2a0   :  { %2044 = vmatmul.mubr.f32.gmra.mrb[54].mxu1 %v826_v25  ;;  %v830_v31 = vadd.f32 %v3140_v30, %v799_v62  ;;  %v800_v54 = vmul.f32 %v3137_v36, %v769_v50 }
 0x2a1   :  { %2046 = vmatprep.mubr.msk.f32.mxu1 %vm2470_vm0, %v2471_v1  ;;  %v723_v42 = vadd.f32 1e-05, %v698_v27  ;;  %v2288_v56 = vpop.eup %2287 }
 0x2a2   :  { %v770_v7 = vmul.f32 %v2288_v56, %v3109_v60  ;;  %v831_v58 = vadd.f32 %v3140_v30, %v800_v54 }
 0x2a3   :  { %2293 = vrsqrt.f32 %v723_v42 }
 0x2a4   :  { %2047 = vmatmul.mubr.f32.gmra.mrb[56].mxu1 %v827_v48  ;;  %v801_v53 = vmul.f32 %v3137_v36, %v770_v7 }
 0x2a5   :  { %2049 = vmatprep.mubr.msk.f32.mxu1 %vm2470_vm0, %v2471_v1  ;;  %v2290_v57 = vpop.eup %2289 }
 0x2a6   :  { %v771_v35 = vmul.f32 %v2290_v57, %v3116_v21  ;;  %v832_v38 = vadd.f32 %v3140_v30, %v801_v53 }
 0x2a8   :  { %2050 = vmatmul.mubr.f32.gmra.mrb[58].mxu1 %v828_v39  ;;  %v802_v60 = vmul.f32 %v3137_v36, %v771_v35 }
 0x2a9   :  { %2052 = vmatprep.mubr.msk.f32.mxu1 %vm2470_vm0, %v2471_v1  ;;  %v2292_v2 = vpop.eup %2291 }
 0x2aa   :  { %v772_v61 = vmul.f32 %v2292_v2, %v3123_v6  ;;  %v833_v15 = vadd.f32 %v3140_v30, %v802_v60 }
 0x2ac   :  { %2053 = vmatmul.mubr.f32.gmra.mrb[60].mxu1 %v829_v51  ;;  %v803_v21 = vmul.f32 %v3137_v36, %v772_v61 }
 0x2ad   :  { %2055 = vmatprep.mubr.msk.f32.mxu1 %vm2470_vm0, %v2471_v1  ;;  %v2294_v14 = vpop.eup %2293 }
 0x2ae   :  { %v773_v63 = vmul.f32 %v2294_v14, %v3130_v12  ;;  %v834_v37 = vadd.f32 %v3140_v30, %v803_v21 }
 0x2b0   :  { %2056 = vmatmul.mubr.f32.gmra.mrb[62].mxu1 %v830_v31  ;;  %v804_v16 = vmul.f32 %v3137_v36, %v773_v63 }
 0x2b1   :  { %2058 = vmatprep.mubr.msk.f32.mxu1 %vm2470_vm0, %v2471_v1 }
 0x2b2   :  { %v835_v6 = vadd.f32 %v3140_v30, %v804_v16 }
 0x2b4   :  { %2059 = vmatmul.mubr.f32.gmra.mrb[64].mxu1 %v831_v58 }
 0x2b5   :  { %2061 = vmatprep.mubr.msk.f32.mxu1 %vm2470_vm0, %v2471_v1 }
 0x2b8   :  { %2062 = vmatmul.mubr.f32.gmra.mrb[66].mxu1 %v832_v38 }
 0x2b9   :  { %2064 = vmatprep.mubr.msk.f32.mxu1 %vm2470_vm0, %v2471_v1 }
 0x2bc   :  { %2065 = vmatmul.mubr.f32.gmra.mrb[68].mxu1 %v833_v15 }
 0x2bd   :  { %2067 = vmatprep.mubr.msk.f32.mxu1 %vm2470_vm0, %v2471_v1 }
 0x2c0   :  { %2068 = vmatmul.mubr.f32.gmra.mrb[70].mxu1 %v834_v37 }
 0x2c1   :  { %2070 = vmatprep.mubr.msk.f32.mxu1 %vm2470_vm0, %v2471_v1 }
 0x2c4   :  { %2071 = vmatmul.mubr.f32.gmra.mrb[72].mxu1 %v835_v6 }
 0x337   :  { %v925_v3 = vpop.f32.mrb[24].mxu1 }
 0x338   :  { %v926_v12 = vadd.f32 %v3264_v5, %v925_v3  ;;  %v2000_v52 = vpop.f32.mrb[25].mxu1 }
 0x33a   :  { %vm1049_vm1 = vcmp.gt.f32.partialorder %v926_v12, 0.0  ;;  %v1074_v20 = vmul.f32 0.01, %v926_v12 }
 0x33b   :  { %v930_v32 = vpop.f32.mrb[26].mxu1 }
 0x33c   :  { %v931_v9 = vadd.f32 %v3264_v5, %v930_v32  ;;  %v2003_v43 = vpop.f32.mrb[27].mxu1  ;;  %v3268_v36 = vsel %vm1049_vm1, %v926_v12, %v1074_v20 }
 0x33d   :  { %1126 = vadd.xlane.f32.xlu0 %v3268_v36 }
 0x33e   :  { %vm1050_vm2 = vcmp.gt.f32.partialorder %v931_v9, 0.0  ;;  %v1075_v10 = vmul.f32 0.01, %v931_v9 }
 0x33f   :  { %v935_v30 = vpop.f32.mrb[28].mxu1 }
 0x340   :  { %v936_v44 = vadd.f32 %v3264_v5, %v935_v30  ;;  %v2006_v17 = vpop.f32.mrb[29].mxu1  ;;  %v3272_v29 = vsel %vm1050_vm2, %v931_v9, %v1075_v10 }
 0x341   :  { %1128 = vadd.xlane.f32.xlu1 %v3272_v29 }
 0x342   :  { %vm1051_vm3 = vcmp.gt.f32.partialorder %v936_v44, 0.0  ;;  %v1076_v34 = vmul.f32 0.01, %v936_v44 }
 0x343   :  { %v940_v45 = vpop.f32.mrb[30].mxu1 }
 0x344   :  { %v941_v23 = vadd.f32 %v3264_v5, %v940_v45  ;;  %v2009_v19 = vpop.f32.mrb[31].mxu1  ;;  %v3276_v24 = vsel %vm1051_vm3, %v936_v44, %v1076_v34 }
 0x345   :  { %1130 = vadd.xlane.f32.xlu0 %v3276_v24 }
 0x346   :  { %vm1052_vm4 = vcmp.gt.f32.partialorder %v941_v23, 0.0  ;;  %v1077_v13 = vmul.f32 0.01, %v941_v23 }
 0x347   :  { %v945_v18 = vpop.f32.mrb[32].mxu1 }
 0x348   :  { %v946_v25 = vadd.f32 %v3264_v5, %v945_v18  ;;  %v2012_v41 = vpop.f32.mrb[33].mxu1  ;;  %v3280_v22 = vsel %vm1052_vm4, %v941_v23, %v1077_v13 }
 0x349   :  { %1132 = vadd.xlane.f32.xlu1 %v3280_v22 }
 0x34a   :  { %vm1053_vm5 = vcmp.gt.f32.partialorder %v946_v25, 0.0  ;;  %v1078_v40 = vmul.f32 0.01, %v946_v25 }
 0x34b   :  { %v950_v46 = vpop.f32.mrb[34].mxu1 }
 0x34c   :  { %v951_v33 = vadd.f32 %v3264_v5, %v950_v46  ;;  %v2015_v26 = vpop.f32.mrb[35].mxu1  ;;  %v3284_v48 = vsel %vm1053_vm5, %v946_v25, %v1078_v40 }
 0x34d   :  { %1134 = vadd.xlane.f32.xlu0 %v3284_v48 }
 0x34e   :  { %vm1054_vm6 = vcmp.gt.f32.partialorder %v951_v33, 0.0  ;;  %v1079_v11 = vmul.f32 0.01, %v951_v33 }
 0x34f   :  { %v955_v59 = vpop.f32.mrb[36].mxu1 }
 0x350   :  { %v956_v28 = vadd.f32 %v3264_v5, %v955_v59  ;;  %v2018_v49 = vpop.f32.mrb[37].mxu1  ;;  %v3288_v27 = vsel %vm1054_vm6, %v951_v33, %v1079_v11 }
 0x351   :  { %1136 = vadd.xlane.f32.xlu1 %v3288_v27 }
 0x352   :  { %vm1055_vm7 = vcmp.gt.f32.partialorder %v956_v28, 0.0  ;;  %v1080_v39 = vmul.f32 0.01, %v956_v28 }
 0x353   :  { %v960_v55 = vpop.f32.mrb[38].mxu1 }
 0x354   :  { %v961_v47 = vadd.f32 %v3264_v5, %v960_v55  ;;  %v2021_v4 = vpop.f32.mrb[39].mxu1  ;;  %v3292_v42 = vsel %vm1055_vm7, %v956_v28, %v1080_v39 }
 0x355   :  { %1138 = vadd.xlane.f32.xlu0 %v3292_v42 }
 0x356   :  { %vm1056_vm8 = vcmp.gt.f32.partialorder %v961_v47, 0.0  ;;  %v1081_v51 = vmul.f32 0.01, %v961_v47 }
 0x357   :  { %v965_v62 = vpop.f32.mrb[40].mxu1 }
 0x358   :  { %v966_v50 = vadd.f32 %v3264_v5, %v965_v62  ;;  %v2024_v56 = vpop.f32.mrb[41].mxu1  ;;  %v3296_v31 = vsel %vm1056_vm8, %v961_v47, %v1081_v51 }
 0x359   :  { %1140 = vadd.xlane.f32.xlu1 %v3296_v31 }
 0x35a   :  { %vm1057_vm9 = vcmp.gt.f32.partialorder %v966_v50, 0.0  ;;  %v1082_v54 = vmul.f32 0.01, %v966_v50 }
 0x35b   :  { %v970_v7 = vpop.f32.mrb[42].mxu1 }
 0x35c   :  { %v971_v57 = vadd.f32 %v3264_v5, %v970_v7  ;;  %v2027_v58 = vpop.f32.mrb[43].mxu1  ;;  %v3300_v53 = vsel %vm1057_vm9, %v966_v50, %v1082_v54 }
 0x35d   :  { %1142 = vadd.xlane.f32.xlu0 %v3300_v53 }
 0x35e   :  { %vm1058_vm10 = vcmp.gt.f32.partialorder %v971_v57, 0.0  ;;  %v1083_v35 = vmul.f32 0.01, %v971_v57 }
 0x35f   :  { %v975_v2 = vpop.f32.mrb[44].mxu1 }
 0x360   :  { %v976_v38 = vadd.f32 %v3264_v5, %v975_v2  ;;  %v2030_v60 = vpop.f32.mrb[45].mxu1  ;;  %v3304_v61 = vsel %vm1058_vm10, %v971_v57, %v1083_v35 }
 0x361   :  { %1144 = vadd.xlane.f32.xlu1 %v3304_v61 }
 0x362   :  { %vm1059_vm11 = vcmp.gt.f32.partialorder %v976_v38, 0.0  ;;  %v1084_v14 = vmul.f32 0.01, %v976_v38 }
 0x363   :  { %v980_v15 = vpop.f32.mrb[46].mxu1 }
 0x364   :  { %v981_v21 = vadd.f32 %v3264_v5, %v980_v15  ;;  %v2033_v63 = vpop.f32.mrb[47].mxu1  ;;  %v3308_v37 = vsel %vm1059_vm11, %v976_v38, %v1084_v14 }
 0x365   :  { %1146 = vadd.xlane.f32.xlu0 %v3308_v37 }
 0x366   :  { %vm1060_vm12 = vcmp.gt.f32.partialorder %v981_v21, 0.0  ;;  %v1085_v16 = vmul.f32 0.01, %v981_v21 }
 0x367   :  { %v985_v6 = vpop.f32.mrb[48].mxu1 }
 0x368   :  { %v986_v3 = vadd.f32 %v3264_v5, %v985_v6  ;;  %v2036_v12 = vpop.f32.mrb[49].mxu1  ;;  %v3312_v52 = vsel %vm1060_vm12, %v981_v21, %v1085_v16 }
 0x369   :  { %1148 = vadd.xlane.f32.xlu1 %v3312_v52 }
 0x36a   :  { %vm1061_vm13 = vcmp.gt.f32.partialorder %v986_v3, 0.0  ;;  %v1086_v20 = vmul.f32 0.01, %v986_v3 }
 0x36b   :  { %v990_v32 = vpop.f32.mrb[50].mxu1 }
 0x36c   :  { %v991_v9 = vadd.f32 %v3264_v5, %v990_v32  ;;  %v2039_v43 = vpop.f32.mrb[51].mxu1  ;;  %v3316_v10 = vsel %vm1061_vm13, %v986_v3, %v1086_v20 }
 0x36d   :  { %1150 = vadd.xlane.f32.xlu0 %v3316_v10 }
 0x36e   :  { %vm1062_vm14 = vcmp.gt.f32.partialorder %v991_v9, 0.0  ;;  %v1087_v30 = vmul.f32 0.01, %v991_v9 }
 0x36f   :  { %v995_v44 = vpop.f32.mrb[52].mxu1 }
 0x370   :  { %v996_v17 = vadd.f32 %v3264_v5, %v995_v44  ;;  %v2042_v34 = vpop.f32.mrb[53].mxu1  ;;  %v3320_v45 = vsel %vm1062_vm14, %v991_v9, %v1087_v30 }
 0x371   :  { %1152 = vadd.xlane.f32.xlu1 %v3320_v45 }
 0x372   :  { %vm1063_vm1 = vcmp.gt.f32.partialorder %v996_v17, 0.0  ;;  %v1088_v23 = vmul.f32 0.01, %v996_v17 }
 0x373   :  { %v1000_v19 = vpop.f32.mrb[54].mxu1 }
 0x374   :  { %v1001_v13 = vadd.f32 %v3264_v5, %v1000_v19  ;;  %v2045_v18 = vpop.f32.mrb[55].mxu1  ;;  %v3324_v25 = vsel %vm1063_vm1, %v996_v17, %v1088_v23 }
 0x375   :  { %1154 = vadd.xlane.f32.xlu0 %v3324_v25 }
 0x376   :  { %vm1064_vm2 = vcmp.gt.f32.partialorder %v1001_v13, 0.0  ;;  %v1089_v41 = vmul.f32 0.01, %v1001_v13 }
 0x377   :  { %v1005_v40 = vpop.f32.mrb[56].mxu1 }
 0x378   :  { %v1006_v46 = vadd.f32 %v3264_v5, %v1005_v40  ;;  %v2048_v33 = vpop.f32.mrb[57].mxu1  ;;  %v3328_v26 = vsel %vm1064_vm2, %v1001_v13, %v1089_v41 }
 0x379   :  { %1156 = vadd.xlane.f32.xlu1 %v3328_v26  ;;  %v1489_v33 = vld [vmem:[%s3780_s9 + $0x8] sm:$0xff] }
 0x37a   :  { %vm1065_vm3 = vcmp.gt.f32.partialorder %v1006_v46, 0.0  ;;  %v1090_v11 = vmul.f32 0.01, %v1006_v46 }
 0x37b   :  { %v1010_v59 = vpop.f32.mrb[58].mxu1 }
 0x37c   :  { %v1011_v28 = vadd.f32 %v3264_v5, %v1010_v59  ;;  %v2051_v49 = vpop.f32.mrb[59].mxu1  ;;  %v3332_v39 = vsel %vm1065_vm3, %v1006_v46, %v1090_v11  ;;  %v1488_v46 = vld [vmem:[%s3780_s9] sm:$0xff]  ;;  %v1491_v59 = vld [vmem:[%s3780_s9 + $0x18] sm:$0xff] }
 0x37d   :  { %1158 = vadd.xlane.f32.xlu0 %v3332_v39  ;;  %v2209_v11 = vpack.c.bf16 %v1489_v33, %v1488_v46  ;;  %v1492_v49 = vld [vmem:[%s3780_s9 + $0x20] sm:$0xff] }
 0x37e   :  { %vm1066_vm4 = vcmp.gt.f32.partialorder %v1011_v28, 0.0  ;;  %v1091_v55 = vmul.f32 0.01, %v1011_v28 }
 0x37f   :  { %v1015_v47 = vpop.f32.mrb[60].mxu1  ;;  %2210 = vmatpush3.bf16.msra.mxu0 %v2209_v11 }
 0x380   :  { %v1016_v4 = vadd.f32 %v3264_v5, %v1015_v47  ;;  %v2054_v51 = vpop.f32.mrb[61].mxu1  ;;  %v3336_v62 = vsel %vm1066_vm4, %v1011_v28, %v1091_v55  ;;  %2211 = vmatprep.subr.bf16.mxu0 %v2469_v0  ;;  %v1493_v55 = vld [vmem:[%s3780_s9 + $0x28] sm:$0xff] }
 0x381   :  { %1160 = vadd.xlane.f32.xlu1 %v3336_v62  ;;  %v2215_v47 = vpack.c.bf16 %v1493_v55, %v1492_v49  ;;  %v1495_v51 = vld [vmem:[%s3780_s9 + $0x38] sm:$0xff] }
 0x382   :  { %vm1067_vm5 = vcmp.gt.f32.partialorder %v1016_v4, 0.0  ;;  %v1092_v50 = vmul.f32 0.01, %v1016_v4 }
 0x383   :  { %v1020_v56 = vpop.f32.mrb[62].mxu1 }
 0x384   :  { %v1021_v54 = vadd.f32 %v3264_v5, %v1020_v56  ;;  %v2057_v7 = vpop.f32.mrb[63].mxu1  ;;  %v3340_v57 = vsel %vm1067_vm5, %v1016_v4, %v1092_v50  ;;  %v1494_v4 = vld [vmem:[%s3780_s9 + $0x30] sm:$0xff]  ;;  %v1496_v56 = vld [vmem:[%s3780_s9 + $0x40] sm:$0xff] }
 0x385   :  { %1162 = vadd.xlane.f32.xlu0 %v3340_v57  ;;  %v2218_v50 = vpack.c.bf16 %v1495_v51, %v1494_v4  ;;  %v1498_v51 = vld [vmem:[%s3780_s9 + $0x50] sm:$0xff] }
 0x386   :  { %vm1068_vm6 = vcmp.gt.f32.partialorder %v1021_v54, 0.0  ;;  %v1093_v58 = vmul.f32 0.01, %v1021_v54 }
 0x387   :  { %v1025_v35 = vpop.f32.mrb[64].mxu1 }
 0x388   :  { %v1026_v2 = vadd.f32 %v3264_v5, %v1025_v35  ;;  %v2060_v38 = vpop.f32.mrb[65].mxu1  ;;  %v3344_v60 = vsel %vm1068_vm6, %v1021_v54, %v1093_v58  ;;  %v1497_v54 = vld [vmem:[%s3780_s9 + $0x48] sm:$0xff] }
 0x389   :  { %1164 = vadd.xlane.f32.xlu1 %v3344_v60  ;;  %v2221_v7 = vpack.c.bf16 %v1497_v54, %v1496_v56 }
 0x38a   :  { %vm1069_vm7 = vcmp.gt.f32.partialorder %v1026_v2, 0.0  ;;  %v1094_v14 = vmul.f32 0.01, %v1026_v2 }
 0x38b   :  { %v1030_v15 = vpop.f32.mrb[66].mxu1 }
 0x38c   :  { %v1031_v21 = vadd.f32 %v3264_v5, %v1030_v15  ;;  %v2063_v63 = vpop.f32.mrb[67].mxu1  ;;  %v3348_v16 = vsel %vm1069_vm7, %v1026_v2, %v1094_v14 }
 0x38d   :  { %1166 = vadd.xlane.f32.xlu1 %v3348_v16 }
 0x38e   :  { %vm1070_vm8 = vcmp.gt.f32.partialorder %v1031_v21, 0.0  ;;  %v1095_v6 = vmul.f32 0.01, %v1031_v21 }
 0x38f   :  { %v1035_v3 = vpop.f32.mrb[68].mxu1 }
 0x390   :  { %v1036_v12 = vadd.f32 %v3264_v5, %v1035_v3  ;;  %v2066_v20 = vpop.f32.mrb[69].mxu1  ;;  %v3352_v32 = vsel %vm1070_vm8, %v1031_v21, %v1095_v6 }
 0x391   :  { %1168 = vadd.xlane.f32.xlu1 %v3352_v32 }
 0x392   :  { %vm1071_vm9 = vcmp.gt.f32.partialorder %v1036_v12, 0.0  ;;  %v1096_v9 = vmul.f32 0.01, %v1036_v12 }
 0x393   :  { %v1040_v43 = vpop.f32.mrb[70].mxu1 }
 0x394   :  { %v1041_v30 = vadd.f32 %v3264_v5, %v1040_v43  ;;  %v2069_v44 = vpop.f32.mrb[71].mxu1  ;;  %v3356_v17 = vsel %vm1071_vm9, %v1036_v12, %v1096_v9 }
 0x395   :  { %1170 = vadd.xlane.f32.xlu1 %v3356_v17 }
 0x396   :  { %vm1072_vm10 = vcmp.gt.f32.partialorder %v1041_v30, 0.0  ;;  %v1097_v34 = vmul.f32 0.01, %v1041_v30 }
 0x397   :  { %v1045_v23 = vpop.f32.mrb[72].mxu1 }
 0x398   :  { %v1046_v19 = vadd.f32 %v3264_v5, %v1045_v23  ;;  %v2072_v13 = vpop.f32.mrb[73].mxu1  ;;  %v3360_v18 = vsel %vm1072_vm10, %v1041_v30, %v1097_v34  ;;  %v1490_v5 = vld [vmem:[%s3780_s9 + $0x10] sm:$0xff] }
 0x399   :  { %1172 = vadd.xlane.f32.xlu1 %v3360_v18  ;;  %v2212_v28 = vpack.c.bf16 %v1491_v59, %v1490_v5 }
 0x39a   :  { %vm1073_vm11 = vcmp.gt.f32.partialorder %v1046_v19, 0.0  ;;  %v1098_v41 = vmul.f32 0.01, %v1046_v19 }
 0x39b   :  { %2213 = vmatpush3.bf16.msra.mxu0 %v2212_v28 }
 0x39c   :  { %v3363_v40 = vsel %vm1073_vm11, %v1046_v19, %v1098_v41  ;;  %2214 = vmatprep.subr.bf16.mxu0 %v2469_v0 }
 0x39d   :  { %1174 = vadd.xlane.f32.xlu1 %v3363_v40 }
 0x39f   :  { %2216 = vmatpush3.bf16.msra.mxu0 %v2215_v47 }
 0x3a0   :  { %2217 = vmatprep.subr.bf16.mxu0 %v2469_v0 }
 0x3a3   :  { %2219 = vmatpush3.bf16.msra.mxu0 %v2218_v50  ;;  %v1499_v50 = vld [vmem:[%s3780_s9 + $0x58] sm:$0xff] }
 0x3a4   :  { %2220 = vmatprep.subr.bf16.mxu0 %v2469_v0  ;;  %v2224_v56 = vpack.c.bf16 %v1499_v50, %v1498_v51 }
 0x3a7   :  { %2222 = vmatpush3.bf16.msra.mxu0 %v2221_v7 }
 0x3a8   :  { %2223 = vmatprep.subr.bf16.mxu0 %v2469_v0 }
 0x3ab   :  { %2225 = vmatpush3.bf16.msra.mxu0 %v2224_v56 }
 0x3ac   :  { %2226 = vmatprep.subr.bf16.mxu0 %v2469_v0 }
 0x3ca   :  { %v1127_v58 = vpop.xlane.xlu0 %1126 }
 0x3cb   :  { %v1176_v35 = vmul.f32 0.02, %v1127_v58 }
 0x3cd   :  { %v1201_v2 = vsub.f32 %v3268_v36, %v1176_v35 }
 0x3ce   :  { %v1129_v38 = vpop.xlane.xlu1 %1128 }
 0x3cf   :  { %v1177_v14 = vmul.f32 0.02, %v1129_v38  ;;  %v3404_v15 = vsel %vm546_vm15, %v1201_v2, 0.0  ;;  %v1500_v2 = vld [vmem:[%s3780_s9 + $0x60] sm:$0xff] }
 0x3d0   :  { %v1251_v21 = vmul.f32 %v3404_v15, %v3404_v15 }
 0x3d1   :  { %v1202_v63 = vsub.f32 %v3272_v29, %v1177_v14 }
 0x3d2   :  { %1276 = vadd.xlane.f32.xlu0 %v1251_v21  ;;  %v1131_v6 = vpop.xlane.xlu0 %1130 }
 0x3d3   :  { %v1178_v3 = vmul.f32 0.02, %v1131_v6  ;;  %v3411_v12 = vsel %vm546_vm15, %v1202_v63, 0.0 }
 0x3d4   :  { %v1252_v36 = vmul.f32 %v3411_v12, %v3411_v12 }
 0x3d5   :  { %v1203_v20 = vsub.f32 %v3276_v24, %v1178_v3 }
 0x3d6   :  { %v1133_v9 = vpop.xlane.xlu1 %1132  ;;  %1278 = vadd.xlane.f32.xlu0 %v1252_v36  ;;  %v1502_v36 = vld [vmem:[%s3780_s9 + $0x70] sm:$0xff] }
 0x3d7   :  { %v1179_v43 = vmul.f32 0.02, %v1133_v9  ;;  %v3418_v30 = vsel %vm546_vm15, %v1203_v20, 0.0 }
 0x3d8   :  { %v1253_v29 = vmul.f32 %v3418_v30, %v3418_v30 }
 0x3d9   :  { %v1204_v44 = vsub.f32 %v3280_v22, %v1179_v43 }
 0x3da   :  { %1280 = vadd.xlane.f32.xlu0 %v1253_v29  ;;  %v1135_v34 = vpop.xlane.xlu0 %1134 }
 0x3db   :  { %v1180_v23 = vmul.f32 0.02, %v1135_v34  ;;  %v3425_v19 = vsel %vm546_vm15, %v1204_v44, 0.0 }
 0x3dc   :  { %v1254_v24 = vmul.f32 %v3425_v19, %v3425_v19 }
 0x3dd   :  { %v1205_v13 = vsub.f32 %v3284_v48, %v1180_v23 }
 0x3de   :  { %v1137_v41 = vpop.xlane.xlu1 %1136  ;;  %1282 = vadd.xlane.f32.xlu0 %v1254_v24 }
 0x3df   :  { %v1181_v46 = vmul.f32 0.02, %v1137_v41  ;;  %v3432_v33 = vsel %vm546_vm15, %v1205_v13, 0.0 }
 0x3e0   :  { %v1255_v22 = vmul.f32 %v3432_v33, %v3432_v33 }
 0x3e1   :  { %v1206_v5 = vsub.f32 %v3288_v27, %v1181_v46 }
 0x3e2   :  { %1284 = vadd.xlane.f32.xlu0 %v1255_v22  ;;  %v1139_v11 = vpop.xlane.xlu0 %1138 }
 0x3e3   :  { %v1182_v59 = vmul.f32 0.02, %v1139_v11  ;;  %v3439_v28 = vsel %vm546_vm15, %v1206_v5, 0.0 }
 0x3e4   :  { %v1256_v48 = vmul.f32 %v3439_v28, %v3439_v28 }
 0x3e5   :  { %v1207_v49 = vsub.f32 %v3292_v42, %v1182_v59 }
 0x3e6   :  { %v1141_v55 = vpop.xlane.xlu1 %1140  ;;  %1286 = vadd.xlane.f32.xlu0 %v1256_v48 }
 0x3e7   :  { %v1183_v47 = vmul.f32 0.02, %v1141_v55  ;;  %v3446_v4 = vsel %vm546_vm15, %v1207_v49, 0.0 }
 0x3e8   :  { %v1257_v27 = vmul.f32 %v3446_v4, %v3446_v4 }
 0x3e9   :  { %v1208_v42 = vsub.f32 %v3296_v31, %v1183_v47  ;;  %v1501_v31 = vld [vmem:[%s3780_s9 + $0x68] sm:$0xff] }
 0x3ea   :  { %1288 = vadd.xlane.f32.xlu1 %v1257_v27  ;;  %v1143_v54 = vpop.xlane.xlu0 %1142  ;;  %v2227_v14 = vpack.c.bf16 %v1501_v31, %v1500_v2 }
 0x3eb   :  { %v1184_v7 = vmul.f32 0.02, %v1143_v54  ;;  %v3459_v58 = vsel %vm546_vm15, %v1208_v42, 0.0 }
 0x3ec   :  { %v1258_v35 = vmul.f32 %v3459_v58, %v3459_v58  ;;  %2228 = vmatpush3.bf16.msra.mxu0 %v2227_v14 }
 0x3ed   :  { %v1209_v38 = vsub.f32 %v3300_v53, %v1184_v7  ;;  %2229 = vmatprep.subr.bf16.mxu0 %v2469_v0  ;;  %v1503_v53 = vld [vmem:[%s3780_s9 + $0x78] sm:$0xff] }
 0x3ee   :  { %v1145_v21 = vpop.xlane.xlu1 %1144  ;;  %1290 = vadd.xlane.f32.xlu0 %v1258_v35  ;;  %v2230_v9 = vpack.c.bf16 %v1503_v53, %v1502_v36 }
 0x3ef   :  { %v1185_v63 = vmul.f32 0.02, %v1145_v21  ;;  %v3473_v6 = vsel %vm546_vm15, %v1209_v38, 0.0 }
 0x3f0   :  { %v1259_v3 = vmul.f32 %v3473_v6, %v3473_v6  ;;  %2231 = vmatpush3.bf16.msra.mxu0 %v2230_v9 }
 0x3f1   :  { %v1210_v20 = vsub.f32 %v3304_v61, %v1185_v63 }
 0x3f2   :  { %1292 = vadd.xlane.f32.xlu1 %v1259_v3  ;;  %v1147_v43 = vpop.xlane.xlu0 %1146 }
 0x3f3   :  { %v1186_v29 = vmul.f32 0.02, %v1147_v43  ;;  %v3487_v44 = vsel %vm546_vm15, %v1210_v20, 0.0 }
 0x3f4   :  { %v1260_v0 = vmul.f32 %v3487_v44, %v3487_v44 }
 0x3f5   :  { %v1211_v34 = vsub.f32 %v3308_v37, %v1186_v29 }
 0x3f6   :  { %v1149_v23 = vpop.xlane.xlu1 %1148  ;;  %1294 = vadd.xlane.f32.xlu0 %v1260_v0 }
 0x3f7   :  { %v1187_v24 = vmul.f32 0.02, %v1149_v23  ;;  %v3494_v61 = vsel %vm546_vm15, %v1211_v34, 0.0 }
 0x3f8   :  { %v1261_v13 = vmul.f32 %v3494_v61, %v3494_v61 }
 0x3f9   :  { %v1212_v41 = vsub.f32 %v3312_v52, %v1187_v24 }
 0x3fa   :  { %1296 = vadd.xlane.f32.xlu1 %v1261_v13  ;;  %v1151_v46 = vpop.xlane.xlu0 %1150 }
 0x3fb   :  { %v1188_v22 = vmul.f32 0.02, %v1151_v46  ;;  %v3501_v5 = vsel %vm546_vm15, %v1212_v41, 0.0 }
 0x3fc   :  { %v1262_v37 = vmul.f32 %v3501_v5, %v3501_v5 }
 0x3fd   :  { %v1213_v11 = vsub.f32 %v3316_v10, %v1188_v22 }
 0x3fe   :  { %v1153_v59 = vpop.xlane.xlu1 %1152  ;;  %1298 = vadd.xlane.f32.xlu0 %v1262_v37 }
 0x3ff   :  { %v1189_v48 = vmul.f32 0.02, %v1153_v59  ;;  %v3508_v49 = vsel %vm546_vm15, %v1213_v11, 0.0 }
 0x400   :  { %v1263_v52 = vmul.f32 %v3508_v49, %v3508_v49 }
 0x401   :  { %v1214_v55 = vsub.f32 %v3320_v45, %v1189_v48 }
 0x402   :  { %1300 = vadd.xlane.f32.xlu1 %v1263_v52  ;;  %v1155_v47 = vpop.xlane.xlu0 %1154 }
 0x403   :  { %v1190_v27 = vmul.f32 0.02, %v1155_v47  ;;  %v3515_v51 = vsel %vm546_vm15, %v1214_v55, 0.0 }
 0x404   :  { %v1264_v10 = vmul.f32 %v3515_v51, %v3515_v51 }
 0x405   :  { %v1215_v50 = vsub.f32 %v3324_v25, %v1190_v27 }
 0x406   :  { %v1157_v42 = vpop.xlane.xlu1 %1156  ;;  %1302 = vadd.xlane.f32.xlu0 %v1264_v10 }
 0x407   :  { %v1191_v56 = vmul.f32 0.02, %v1157_v42  ;;  %v3522_v54 = vsel %vm546_vm15, %v1215_v50, 0.0 }
 0x408   :  { %v1265_v45 = vmul.f32 %v3522_v54, %v3522_v54 }
 0x409   :  { %v1216_v7 = vsub.f32 %v3328_v26, %v1191_v56 }
 0x40a   :  { %1304 = vadd.xlane.f32.xlu1 %v1265_v45  ;;  %v1159_v35 = vpop.xlane.xlu0 %1158 }
 0x40b   :  { %v1192_v2 = vmul.f32 0.02, %v1159_v35  ;;  %v3529_v31 = vsel %vm546_vm15, %v1216_v7, 0.0 }
 0x40c   :  { %v1266_v25 = vmul.f32 %v3529_v31, %v3529_v31 }
 0x40d   :  { %v1217_v38 = vsub.f32 %v3332_v39, %v1192_v2 }
 0x40e   :  { %v1161_v14 = vpop.xlane.xlu1 %1160  ;;  %1306 = vadd.xlane.f32.xlu0 %v1266_v25 }
 0x40f   :  { %v1193_v21 = vmul.f32 0.02, %v1161_v14  ;;  %v3536_v63 = vsel %vm546_vm15, %v1217_v38, 0.0 }
 0x410   :  { %v1267_v26 = vmul.f32 %v3536_v63, %v3536_v63 }
 0x411   :  { %v1218_v3 = vsub.f32 %v3336_v62, %v1193_v21 }
 0x412   :  { %1308 = vadd.xlane.f32.xlu1 %v1267_v26  ;;  %v1163_v36 = vpop.xlane.xlu0 %1162 }
 0x413   :  { %v1194_v53 = vmul.f32 0.02, %v1163_v36  ;;  %v3543_v20 = vsel %vm546_vm15, %v1218_v3, 0.0 }
 0x414   :  { %v1268_v39 = vmul.f32 %v3543_v20, %v3543_v20 }
 0x415   :  { %v1219_v9 = vsub.f32 %v3340_v57, %v1194_v53 }
 0x416   :  { %v1165_v43 = vpop.xlane.xlu1 %1164  ;;  %1310 = vadd.xlane.f32.xlu0 %v1268_v39 }
 0x417   :  { %v1195_v29 = vmul.f32 0.02, %v1165_v43  ;;  %v3550_v0 = vsel %vm546_vm15, %v1219_v9, 0.0  ;;  %v3596_v43 = vld [vmem:[#allocation8] ss:$0 sm:$0xff] }
 0x418   :  { %v1269_v62 = vmul.f32 %v3550_v0, %v3550_v0 }
 0x419   :  { %v1220_v34 = vsub.f32 %v3344_v60, %v1195_v29 }
 0x41a   :  { %v1167_v23 = vpop.xlane.xlu1 %1166  ;;  %1312 = vadd.xlane.f32.xlu1 %v1269_v62 }
 0x41b   :  { %v1196_v24 = vmul.f32 0.02, %v1167_v23  ;;  %v3557_v13 = vsel %vm546_vm15, %v1220_v34, 0.0  ;;  %v3602_v23 = vld [vmem:[%s3779_s8] ss:$0 sm:$0xff] }
 0x41c   :  { %v1270_v57 = vmul.f32 %v3557_v13, %v3557_v13 }
 0x41d   :  { %v1221_v41 = vsub.f32 %v3348_v16, %v1196_v24 }
 0x41e   :  { %v1169_v46 = vpop.xlane.xlu1 %1168  ;;  %1314 = vadd.xlane.f32.xlu0 %v1270_v57 }
 0x41f   :  { %v1197_v22 = vmul.f32 0.02, %v1169_v46  ;;  %v3564_v37 = vsel %vm546_vm15, %v1221_v41, 0.0 }
 0x420   :  { %v1271_v60 = vmul.f32 %v3564_v37, %v3564_v37 }
 0x421   :  { %v1222_v11 = vsub.f32 %v3352_v32, %v1197_v22 }
 0x422   :  { %v1171_v59 = vpop.xlane.xlu1 %1170  ;;  %1316 = vadd.xlane.f32.xlu1 %v1271_v60 }
 0x423   :  { %v1198_v48 = vmul.f32 0.02, %v1171_v59  ;;  %v3571_v52 = vsel %vm546_vm15, %v1222_v11, 0.0 }
 0x424   :  { %v1272_v16 = vmul.f32 %v3571_v52, %v3571_v52 }
 0x425   :  { %v1223_v55 = vsub.f32 %v3356_v17, %v1198_v48 }
 0x426   :  { %v1173_v47 = vpop.xlane.xlu1 %1172  ;;  %1318 = vadd.xlane.f32.xlu0 %v1272_v16 }
 0x427   :  { %v1199_v27 = vmul.f32 0.02, %v1173_v47  ;;  %v3578_v10 = vsel %vm546_vm15, %v1223_v55, 0.0 }
 0x428   :  { %v1273_v32 = vmul.f32 %v3578_v10, %v3578_v10 }
 0x429   :  { %v1224_v50 = vsub.f32 %v3360_v18, %v1199_v27 }
 0x42a   :  { %v1175_v42 = vpop.xlane.xlu1 %1174  ;;  %1320 = vadd.xlane.f32.xlu1 %v1273_v32 }
 0x42b   :  { %v3585_v56 = vsel %vm546_vm15, %v1224_v50, 0.0  ;;  %v1200_v45 = vmul.f32 0.02, %v1175_v42 }
 0x42c   :  { %v1274_v17 = vmul.f32 %v3585_v56, %v3585_v56 }
 0x42d   :  { %v1225_v7 = vsub.f32 %v3363_v40, %v1200_v45 }
 0x42e   :  { %1322 = vadd.xlane.f32.xlu0 %v1274_v17 }
 0x42f   :  { %v3592_v35 = vsel %vm546_vm15, %v1225_v7, 0.0 }
 0x430   :  { %v1275_v18 = vmul.f32 %v3592_v35, %v3592_v35 }
 0x432   :  { %1324 = vadd.xlane.f32.xlu1 %v1275_v18 }
 0x45f   :  { %v1277_v2 = vpop.xlane.xlu0 %1276 }
 0x460   :  { %v1326_v25 = vmul.f32 0.02, %v1277_v2 }
 0x462   :  { %v1351_v38 = vadd.f32 1e-05, %v1326_v25 }
 0x463   :  { %v1279_v14 = vpop.xlane.xlu0 %1278 }
 0x464   :  { %2295 = vrsqrt.f32 %v1351_v38  ;;  %v1327_v21 = vmul.f32 0.02, %v1279_v14 }
 0x466   :  { %v1352_v26 = vadd.f32 1e-05, %v1327_v21 }
 0x467   :  { %v1281_v3 = vpop.xlane.xlu0 %1280 }
 0x468   :  { %2297 = vrsqrt.f32 %v1352_v26  ;;  %v1328_v36 = vmul.f32 0.02, %v1281_v3 }
 0x46a   :  { %v1353_v40 = vadd.f32 1e-05, %v1328_v36 }
 0x46b   :  { %v1283_v53 = vpop.xlane.xlu0 %1282 }
 0x46c   :  { %2299 = vrsqrt.f32 %v1353_v40  ;;  %v1329_v8 = vmul.f32 0.02, %v1283_v53 }
 0x46e   :  { %v2296_v39 = vpop.eup %2295  ;;  %v1354_v9 = vadd.f32 1e-05, %v1329_v8 }
 0x46f   :  { %v1401_v29 = vmul.f32 %v2296_v39, %v3404_v15  ;;  %v1285_v62 = vpop.xlane.xlu0 %1284 }
 0x470   :  { %2301 = vrsqrt.f32 %v1354_v9  ;;  %v1330_v34 = vmul.f32 0.02, %v1285_v62 }
 0x471   :  { %v1432_v24 = vmul.f32 %v3596_v43, %v1401_v29 }
 0x472   :  { %v2298_v57 = vpop.eup %2297  ;;  %v1355_v41 = vadd.f32 1e-05, %v1330_v34 }
 0x473   :  { %v1287_v46 = vpop.xlane.xlu0 %1286  ;;  %v1463_v22 = vadd.f32 %v3602_v23, %v1432_v24  ;;  %v1402_v60 = vmul.f32 %v2298_v57, %v3411_v12 }
 0x474   :  { %2303 = vrsqrt.f32 %v1355_v41  ;;  %v1331_v11 = vmul.f32 0.02, %v1287_v46 }
 0x475   :  { %2106 = vmatmul.mubr.f32.vlgmr.msra.gmra.mrb[26].mxu0 %v1463_v22  ;;  %v1433_v15 = vmul.f32 %v3596_v43, %v1402_v60 }
 0x476   :  { %v2300_v59 = vpop.eup %2299  ;;  %v1356_v48 = vadd.f32 1e-05, %v1331_v11  ;;  %2108 = vmatprep.mubr.msk.f32.mxu0 %vm2470_vm0, %v2471_v1 }
 0x477   :  { %v1289_v16 = vpop.xlane.xlu1 %1288  ;;  %v1464_v55 = vadd.f32 %v3602_v23, %v1433_v15  ;;  %v1403_v47 = vmul.f32 %v2300_v59, %v3418_v30 }
 0x478   :  { %2305 = vrsqrt.f32 %v1356_v48  ;;  %v1332_v27 = vmul.f32 0.02, %v1289_v16 }
 0x479   :  { %2109 = vmatmul.mubr.f32.gmra.mrb[28].mxu0 %v1464_v55  ;;  %v1434_v12 = vmul.f32 %v3596_v43, %v1403_v47 }
 0x47a   :  { %v2302_v32 = vpop.eup %2301  ;;  %v1357_v50 = vadd.f32 1e-05, %v1332_v27  ;;  %2111 = vmatprep.mubr.msk.f32.mxu0 %vm2470_vm0, %v2471_v1 }
 0x47b   :  { %v1291_v42 = vpop.xlane.xlu0 %1290  ;;  %v1465_v45 = vadd.f32 %v3602_v23, %v1434_v12  ;;  %v1404_v17 = vmul.f32 %v2302_v32, %v3425_v19 }
 0x47c   :  { %2307 = vrsqrt.f32 %v1357_v50  ;;  %v1333_v7 = vmul.f32 0.02, %v1291_v42 }
 0x47d   :  { %2112 = vmatmul.mubr.f32.gmra.mrb[30].mxu0 %v1465_v45  ;;  %v1435_v30 = vmul.f32 %v3596_v43, %v1404_v17 }
 0x47e   :  { %v2304_v18 = vpop.eup %2303  ;;  %v1358_v2 = vadd.f32 1e-05, %v1333_v7  ;;  %2114 = vmatprep.mubr.msk.f32.mxu0 %vm2470_vm0, %v2471_v1 }
 0x47f   :  { %v1293_v25 = vpop.xlane.xlu1 %1292  ;;  %v1466_v38 = vadd.f32 %v3602_v23, %v1435_v30  ;;  %v1405_v14 = vmul.f32 %v2304_v18, %v3432_v33 }
 0x480   :  { %2309 = vrsqrt.f32 %v1358_v2  ;;  %v1334_v21 = vmul.f32 0.02, %v1293_v25 }
 0x481   :  { %2115 = vmatmul.mubr.f32.gmra.mrb[32].mxu0 %v1466_v38  ;;  %v1436_v19 = vmul.f32 %v3596_v43, %v1405_v14 }
 0x482   :  { %v2306_v26 = vpop.eup %2305  ;;  %v1359_v3 = vadd.f32 1e-05, %v1334_v21  ;;  %2117 = vmatprep.mubr.msk.f32.mxu0 %vm2470_vm0, %v2471_v1 }
 0x483   :  { %v1295_v36 = vpop.xlane.xlu0 %1294  ;;  %v1467_v40 = vadd.f32 %v3602_v23, %v1436_v19  ;;  %v1406_v53 = vmul.f32 %v2306_v26, %v3439_v28 }
 0x484   :  { %2311 = vrsqrt.f32 %v1359_v3  ;;  %v1335_v8 = vmul.f32 0.02, %v1295_v36 }
 0x485   :  { %2118 = vmatmul.mubr.f32.gmra.mrb[34].mxu0 %v1467_v40  ;;  %v1437_v33 = vmul.f32 %v3596_v43, %v1406_v53 }
 0x486   :  { %v2308_v39 = vpop.eup %2307  ;;  %v1360_v9 = vadd.f32 1e-05, %v1335_v8  ;;  %2120 = vmatprep.mubr.msk.f32.mxu0 %vm2470_vm0, %v2471_v1 }
 0x487   :  { %v1297_v29 = vpop.xlane.xlu1 %1296  ;;  %v1468_v62 = vadd.f32 %v3602_v23, %v1437_v33  ;;  %v1407_v34 = vmul.f32 %v2308_v39, %v3446_v4 }
 0x488   :  { %2313 = vrsqrt.f32 %v1360_v9  ;;  %v1336_v24 = vmul.f32 0.02, %v1297_v29 }
 0x489   :  { %2121 = vmatmul.mubr.f32.gmra.mrb[36].mxu0 %v1468_v62  ;;  %v1438_v28 = vmul.f32 %v3596_v43, %v1407_v34 }
 0x48a   :  { %v2310_v57 = vpop.eup %2309  ;;  %v1361_v41 = vadd.f32 1e-05, %v1336_v24  ;;  %2123 = vmatprep.mubr.msk.f32.mxu0 %vm2470_vm0, %v2471_v1 }
 0x48b   :  { %v1299_v46 = vpop.xlane.xlu0 %1298  ;;  %v1469_v22 = vadd.f32 %v3602_v23, %v1438_v28  ;;  %v1408_v60 = vmul.f32 %v2310_v57, %v3459_v58 }
 0x48c   :  { %2315 = vrsqrt.f32 %v1361_v41  ;;  %v1337_v11 = vmul.f32 0.02, %v1299_v46 }
 0x48d   :  { %2124 = vmatmul.mubr.f32.gmra.mrb[38].mxu0 %v1469_v22  ;;  %v1439_v4 = vmul.f32 %v3596_v43, %v1408_v60 }
 0x48e   :  { %v2312_v15 = vpop.eup %2311  ;;  %v1362_v59 = vadd.f32 1e-05, %v1337_v11  ;;  %2126 = vmatprep.mubr.msk.f32.mxu0 %vm2470_vm0, %v2471_v1 }
 0x48f   :  { %v1301_v48 = vpop.xlane.xlu1 %1300  ;;  %v1470_v16 = vadd.f32 %v3602_v23, %v1439_v4  ;;  %v1409_v55 = vmul.f32 %v2312_v15, %v3473_v6 }
 0x490   :  { %2317 = vrsqrt.f32 %v1362_v59  ;;  %v1338_v47 = vmul.f32 0.02, %v1301_v48 }
 0x491   :  { %2127 = vmatmul.mubr.f32.gmra.mrb[40].mxu0 %v1470_v16  ;;  %v1440_v58 = vmul.f32 %v3596_v43, %v1409_v55 }
 0x492   :  { %v2314_v27 = vpop.eup %2313  ;;  %v1363_v12 = vadd.f32 1e-05, %v1338_v47  ;;  %2129 = vmatprep.mubr.msk.f32.mxu0 %vm2470_vm0, %v2471_v1 }
 0x493   :  { %v1303_v32 = vpop.xlane.xlu0 %1302  ;;  %v1471_v50 = vadd.f32 %v3602_v23, %v1440_v58  ;;  %v1410_v42 = vmul.f32 %v2314_v27, %v3487_v44 }
 0x494   :  { %2319 = vrsqrt.f32 %v1363_v12  ;;  %v1339_v45 = vmul.f32 0.02, %v1303_v32 }
 0x495   :  { %2130 = vmatmul.mubr.f32.gmra.mrb[42].mxu0 %v1471_v50  ;;  %v1441_v6 = vmul.f32 %v3596_v43, %v1410_v42 }
 0x496   :  { %v2316_v17 = vpop.eup %2315  ;;  %v1364_v7 = vadd.f32 1e-05, %v1339_v45  ;;  %2132 = vmatprep.mubr.msk.f32.mxu0 %vm2470_vm0, %v2471_v1 }
 0x497   :  { %v1305_v30 = vpop.xlane.xlu1 %1304  ;;  %v1472_v18 = vadd.f32 %v3602_v23, %v1441_v6  ;;  %v1411_v2 = vmul.f32 %v2316_v17, %v3494_v61 }
 0x498   :  { %2321 = vrsqrt.f32 %v1364_v7  ;;  %v1340_v25 = vmul.f32 0.02, %v1305_v30 }
 0x499   :  { %2133 = vmatmul.mubr.f32.gmra.mrb[44].mxu0 %v1472_v18  ;;  %v1442_v44 = vmul.f32 %v3596_v43, %v1411_v2 }
 0x49a   :  { %v2318_v38 = vpop.eup %2317  ;;  %v1365_v14 = vadd.f32 1e-05, %v1340_v25  ;;  %2135 = vmatprep.mubr.msk.f32.mxu0 %vm2470_vm0, %v2471_v1 }
 0x49b   :  { %v1307_v21 = vpop.xlane.xlu0 %1306  ;;  %v1473_v19 = vadd.f32 %v3602_v23, %v1442_v44  ;;  %v1412_v26 = vmul.f32 %v2318_v38, %v3501_v5 }
 0x49c   :  { %2323 = vrsqrt.f32 %v1365_v14  ;;  %v1341_v3 = vmul.f32 0.02, %v1307_v21 }
 0x49d   :  { %2136 = vmatmul.mubr.f32.gmra.mrb[46].mxu0 %v1473_v19  ;;  %v1443_v61 = vmul.f32 %v3596_v43, %v1412_v26 }
 0x49e   :  { %v2320_v36 = vpop.eup %2319  ;;  %v1366_v40 = vadd.f32 1e-05, %v1341_v3  ;;  %2138 = vmatprep.mubr.msk.f32.mxu0 %vm2470_vm0, %v2471_v1 }
 0x49f   :  { %v1309_v53 = vpop.xlane.xlu1 %1308  ;;  %v1474_v8 = vadd.f32 %v3602_v23, %v1443_v61  ;;  %v1413_v33 = vmul.f32 %v2320_v36, %v3508_v49 }
 0x4a0   :  { %2325 = vrsqrt.f32 %v1366_v40  ;;  %v1342_v39 = vmul.f32 0.02, %v1309_v53 }
 0x4a1   :  { %2139 = vmatmul.mubr.f32.gmra.mrb[48].mxu0 %v1474_v8  ;;  %v1444_v5 = vmul.f32 %v3596_v43, %v1413_v33 }
 0x4a2   :  { %v2322_v9 = vpop.eup %2321  ;;  %v1367_v29 = vadd.f32 1e-05, %v1342_v39  ;;  %2141 = vmatprep.mubr.msk.f32.mxu0 %vm2470_vm0, %v2471_v1 }
 0x4a3   :  { %v1311_v62 = vpop.xlane.xlu0 %1310  ;;  %v1475_v34 = vadd.f32 %v3602_v23, %v1444_v5  ;;  %v1414_v24 = vmul.f32 %v2322_v9, %v3515_v51 }
 0x4a4   :  { %2327 = vrsqrt.f32 %v1367_v29  ;;  %v1343_v28 = vmul.f32 0.02, %v1311_v62 }
 0x4a5   :  { %2142 = vmatmul.mubr.f32.gmra.mrb[50].mxu0 %v1475_v34  ;;  %v1445_v49 = vmul.f32 %v3596_v43, %v1414_v24 }
 0x4a6   :  { %v2324_v57 = vpop.eup %2323  ;;  %v1368_v41 = vadd.f32 1e-05, %v1343_v28  ;;  %2144 = vmatprep.mubr.msk.f32.mxu0 %vm2470_vm0, %v2471_v1 }
 0x4a7   :  { %v1313_v46 = vpop.xlane.xlu1 %1312  ;;  %v1476_v22 = vadd.f32 %v3602_v23, %v1445_v49  ;;  %v1415_v60 = vmul.f32 %v2324_v57, %v3522_v54 }
 0x4a8   :  { %2329 = vrsqrt.f32 %v1368_v41  ;;  %v1344_v11 = vmul.f32 0.02, %v1313_v46 }
 0x4a9   :  { %2145 = vmatmul.mubr.f32.gmra.mrb[52].mxu0 %v1476_v22  ;;  %v1446_v51 = vmul.f32 %v3596_v43, %v1415_v60 }
 0x4aa   :  { %v2326_v4 = vpop.eup %2325  ;;  %v1369_v15 = vadd.f32 1e-05, %v1344_v11  ;;  %2147 = vmatprep.mubr.msk.f32.mxu0 %vm2470_vm0, %v2471_v1 }
 0x4ab   :  { %v1315_v59 = vpop.xlane.xlu0 %1314  ;;  %v1477_v48 = vadd.f32 %v3602_v23, %v1446_v51  ;;  %v1416_v16 = vmul.f32 %v2326_v4, %v3529_v31 }
 0x4ac   :  { %2331 = vrsqrt.f32 %v1369_v15  ;;  %v1345_v55 = vmul.f32 0.02, %v1315_v59 }
 0x4ad   :  { %2148 = vmatmul.mubr.f32.gmra.mrb[54].mxu0 %v1477_v48  ;;  %v1447_v54 = vmul.f32 %v3596_v43, %v1416_v16 }
 0x4ae   :  { %v2328_v47 = vpop.eup %2327  ;;  %v1370_v58 = vadd.f32 1e-05, %v1345_v55  ;;  %2150 = vmatprep.mubr.msk.f32.mxu0 %vm2470_vm0, %v2471_v1 }
 0x4af   :  { %v1317_v27 = vpop.xlane.xlu1 %1316  ;;  %v1478_v12 = vadd.f32 %v3602_v23, %v1447_v54  ;;  %v1417_v32 = vmul.f32 %v2328_v47, %v3536_v63 }
 0x4b0   :  { %2333 = vrsqrt.f32 %v1370_v58  ;;  %v1346_v50 = vmul.f32 0.02, %v1317_v27 }
 0x4b1   :  { %2151 = vmatmul.mubr.f32.gmra.mrb[56].mxu0 %v1478_v12  ;;  %v1448_v31 = vmul.f32 %v3596_v43, %v1417_v32 }
 0x4b2   :  { %v2330_v42 = vpop.eup %2329  ;;  %v1371_v45 = vadd.f32 1e-05, %v1346_v50  ;;  %2153 = vmatprep.mubr.msk.f32.mxu0 %vm2470_vm0, %v2471_v1 }
 0x4b3   :  { %v1319_v6 = vpop.xlane.xlu0 %1318  ;;  %v1479_v17 = vadd.f32 %v3602_v23, %v1448_v31  ;;  %v1418_v7 = vmul.f32 %v2330_v42, %v3543_v20 }
 0x4b4   :  { %2335 = vrsqrt.f32 %v1371_v45  ;;  %v1347_v30 = vmul.f32 0.02, %v1319_v6 }
 0x4b5   :  { %2154 = vmatmul.mubr.f32.gmra.mrb[58].mxu0 %v1479_v17  ;;  %v1449_v63 = vmul.f32 %v3596_v43, %v1418_v7 }
 0x4b6   :  { %v2332_v18 = vpop.eup %2331  ;;  %v1372_v2 = vadd.f32 1e-05, %v1347_v30  ;;  %2156 = vmatprep.mubr.msk.f32.mxu0 %vm2470_vm0, %v2471_v1 }
 0x4b7   :  { %v1321_v25 = vpop.xlane.xlu1 %1320  ;;  %v1480_v44 = vadd.f32 %v3602_v23, %v1449_v63  ;;  %v1419_v38 = vmul.f32 %v2332_v18, %v3550_v0 }
 0x4b8   :  { %2337 = vrsqrt.f32 %v1372_v2  ;;  %v1348_v14 = vmul.f32 0.02, %v1321_v25 }
 0x4b9   :  { %2157 = vmatmul.mubr.f32.gmra.mrb[60].mxu0 %v1480_v44  ;;  %v1450_v20 = vmul.f32 %v3596_v43, %v1419_v38 }
 0x4ba   :  { %v2334_v21 = vpop.eup %2333  ;;  %v1373_v19 = vadd.f32 1e-05, %v1348_v14  ;;  %2159 = vmatprep.mubr.msk.f32.mxu0 %vm2470_vm0, %v2471_v1 }
 0x4bb   :  { %v1323_v26 = vpop.xlane.xlu0 %1322  ;;  %v1481_v3 = vadd.f32 %v3602_v23, %v1450_v20  ;;  %v1420_v61 = vmul.f32 %v2334_v21, %v3557_v13 }
 0x4bc   :  { %2339 = vrsqrt.f32 %v1373_v19  ;;  %v1349_v36 = vmul.f32 0.02, %v1323_v26 }
 0x4bd   :  { %2160 = vmatmul.mubr.f32.gmra.mrb[62].mxu0 %v1481_v3  ;;  %v1451_v0 = vmul.f32 %v3596_v43, %v1420_v61 }
 0x4be   :  { %v2336_v40 = vpop.eup %2335  ;;  %v1374_v53 = vadd.f32 1e-05, %v1349_v36  ;;  %2162 = vmatprep.mubr.msk.f32.mxu0 %vm2470_vm0, %v2471_v1 }
 0x4bf   :  { %v1325_v8 = vpop.xlane.xlu1 %1324  ;;  %v1482_v33 = vadd.f32 %v3602_v23, %v1451_v0  ;;  %v1421_v39 = vmul.f32 %v2336_v40, %v3564_v37 }
 0x4c0   :  { %2341 = vrsqrt.f32 %v1374_v53  ;;  %v1350_v5 = vmul.f32 0.02, %v1325_v8 }
 0x4c1   :  { %2163 = vmatmul.mubr.f32.gmra.mrb[64].mxu0 %v1482_v33  ;;  %v1452_v13 = vmul.f32 %v3596_v43, %v1421_v39 }
 0x4c2   :  { %v2338_v9 = vpop.eup %2337  ;;  %v1375_v29 = vadd.f32 1e-05, %v1350_v5  ;;  %2165 = vmatprep.mubr.msk.f32.mxu0 %vm2470_vm0, %v2471_v1 }
 0x4c3   :  { %v1483_v62 = vadd.f32 %v3602_v23, %v1452_v13  ;;  %v1422_v34 = vmul.f32 %v2338_v9, %v3571_v52 }
 0x4c4   :  { %2343 = vrsqrt.f32 %v1375_v29 }
 0x4c5   :  { %2166 = vmatmul.mubr.f32.gmra.mrb[66].mxu0 %v1483_v62  ;;  %v1453_v24 = vmul.f32 %v3596_v43, %v1422_v34 }
 0x4c6   :  { %v2340_v28 = vpop.eup %2339  ;;  %2168 = vmatprep.mubr.msk.f32.mxu0 %vm2470_vm0, %v2471_v1 }
 0x4c7   :  { %v1484_v37 = vadd.f32 %v3602_v23, %v1453_v24  ;;  %v1423_v49 = vmul.f32 %v2340_v28, %v3578_v10 }
 0x4c9   :  { %2169 = vmatmul.mubr.f32.gmra.mrb[68].mxu0 %v1484_v37  ;;  %v1454_v57 = vmul.f32 %v3596_v43, %v1423_v49 }
 0x4ca   :  { %v2342_v41 = vpop.eup %2341  ;;  %2171 = vmatprep.mubr.msk.f32.mxu0 %vm2470_vm0, %v2471_v1 }
 0x4cb   :  { %v1485_v52 = vadd.f32 %v3602_v23, %v1454_v57  ;;  %v1424_v46 = vmul.f32 %v2342_v41, %v3585_v56  ;;  %v3729_v56 = vld [vmem:[%s3781_s10] ss:$0 sm:$0xff]  ;;  %s2473_s10 = smov [#allocation10]  }
 0x4cc   :  { %s1731_s16 = sshll.u32 %s2473_s10, 4  ;;  %s1732_s16 = int_to_ptr.vmem [resolvable:$true] %s1731_s16 }
 0x4cd   :  { %2172 = vmatmul.mubr.f32.gmra.mrb[70].mxu0 %v1485_v52  ;;  %v1455_v22 = vmul.f32 %v3596_v43, %v1424_v46  ;;  %s2433_s1 = scalar_lea.vmem %s1732_s16, 3200  ;;  %p2438_p5 = scmp.lt.s32.totalorder %s1732_s16, %s1732_s16 }
 0x4ce   :  { %v2344_v60 = vpop.eup %2343  ;;  %2174 = vmatprep.mubr.msk.f32.mxu0 %vm2470_vm0, %v2471_v1  ;;  %p2434_p4 = scmp.ne.s32.totalorder %s1732_s16, %s2433_s1  ;;  %p2439_p6 = scmp.lt.s32.totalorder %s2433_s1, %s2433_s1 }
 0x4cf   :  { %v1486_v10 = vadd.f32 %v3602_v23, %v1455_v22  ;;  %v1425_v11 = vmul.f32 %v2344_v60, %v3592_v35 }
 0x4d0   :  { %p2440_p7 = por %p2439_p6, %p2438_p5 }
 0x4d1   :  { %2175 = vmatmul.mubr.f32.gmra.mrb[72].mxu0 %v1486_v10  ;;  %v1456_v51 = vmul.f32 %v3596_v43, %v1425_v11 }
 0x4d2   :  { %2177 = vmatprep.mubr.msk.f32.mxu0 %vm2470_vm0, %v2471_v1  ;;  %p2441_p8 = pnand %p2440_p7, %p2434_p4 }
 0x4d3   :  { %v1487_v4 = vadd.f32 %v3602_v23, %v1456_v51 }
 0x4d5   :  { %2178 = vmatmul.mubr.f32.gmra.mrb[74].mxu0 %v1487_v4 }
 0x548   :  { %v1577_v15 = vpop.f32.mrb[26].mxu0 }
 0x549   :  { %v1578_v59 = vadd.f32 %v3729_v56, %v1577_v15  ;;  %v2107_v48 = vpop.f32.mrb[27].mxu0 }
 0x54b   :  { %1701 = vst [vmem:[#allocation10] sm:$0xff] %v1578_v59 }
 0x54c   :  { %v1582_v35 = vpop.f32.mrb[28].mxu0 }
 0x54d   :  { %v1583_v16 = vadd.f32 %v3729_v56, %v1582_v35  ;;  %v2110_v43 = vpop.f32.mrb[29].mxu0 }
 0x54f   :  { %1702 = vst [vmem:[#allocation10 + $0x8] sm:$0xff] %v1583_v16 }
 0x550   :  { %v1587_v55 = vpop.f32.mrb[30].mxu0 }
 0x551   :  { %v1588_v1 = vadd.f32 %v3729_v56, %v1587_v55  ;;  %v2113_v23 = vpop.f32.mrb[31].mxu0 }
 0x553   :  { %1703 = vst [vmem:[#allocation10 + $0x10] sm:$0xff] %v1588_v1 }
 0x554   :  { %v1592_v54 = vpop.f32.mrb[32].mxu0 }
 0x555   :  { %v1593_v47 = vadd.f32 %v3729_v56, %v1592_v54  ;;  %v2116_v58 = vpop.f32.mrb[33].mxu0 }
 0x557   :  { %1704 = vst [vmem:[#allocation10 + $0x18] sm:$0xff] %v1593_v47 }
 0x558   :  { %v1597_v27 = vpop.f32.mrb[34].mxu0 }
 0x559   :  { %v1598_v12 = vadd.f32 %v3729_v56, %v1597_v27  ;;  %v2119_v32 = vpop.f32.mrb[35].mxu0 }
 0x55b   :  { %1705 = vst [vmem:[#allocation10 + $0x20] sm:$0xff] %v1598_v12 }
 0x55c   :  { %v1602_v50 = vpop.f32.mrb[36].mxu0 }
 0x55d   :  { %v1603_v31 = vadd.f32 %v3729_v56, %v1602_v50  ;;  %v2122_v42 = vpop.f32.mrb[37].mxu0 }
 0x55f   :  { %1706 = vst [vmem:[#allocation10 + $0x28] sm:$0xff] %v1603_v31 }
 0x560   :  { %v1607_v45 = vpop.f32.mrb[38].mxu0 }
 0x561   :  { %v1608_v6 = vadd.f32 %v3729_v56, %v1607_v45  ;;  %v2125_v17 = vpop.f32.mrb[39].mxu0 }
 0x563   :  { %1707 = vst [vmem:[#allocation10 + $0x30] sm:$0xff] %v1608_v6 }
 0x564   :  { %v1612_v7 = vpop.f32.mrb[40].mxu0 }
 0x565   :  { %v1613_v30 = vadd.f32 %v3729_v56, %v1612_v7  ;;  %v2128_v63 = vpop.f32.mrb[41].mxu0 }
 0x567   :  { %1708 = vst [vmem:[#allocation10 + $0x38] sm:$0xff] %v1613_v30 }
 0x568   :  { %v1617_v18 = vpop.f32.mrb[42].mxu0 }
 0x569   :  { %v1618_v2 = vadd.f32 %v3729_v56, %v1617_v18  ;;  %v2131_v25 = vpop.f32.mrb[43].mxu0 }
 0x56b   :  { %1709 = vst [vmem:[#allocation10 + $0x40] sm:$0xff] %v1618_v2 }
 0x56c   :  { %v1622_v44 = vpop.f32.mrb[44].mxu0 }
 0x56d   :  { %v1623_v38 = vadd.f32 %v3729_v56, %v1622_v44  ;;  %v2134_v14 = vpop.f32.mrb[45].mxu0 }
 0x56f   :  { %1710 = vst [vmem:[#allocation10 + $0x48] sm:$0xff] %v1623_v38 }
 0x570   :  { %v1627_v20 = vpop.f32.mrb[46].mxu0 }
 0x571   :  { %v1628_v21 = vadd.f32 %v3729_v56, %v1627_v20  ;;  %v2137_v19 = vpop.f32.mrb[47].mxu0 }
 0x573   :  { %1711 = vst [vmem:[#allocation10 + $0x50] sm:$0xff] %v1628_v21 }
 0x574   :  { %v1632_v26 = vpop.f32.mrb[48].mxu0 }
 0x575   :  { %v1633_v3 = vadd.f32 %v3729_v56, %v1632_v26  ;;  %v2140_v61 = vpop.f32.mrb[49].mxu0 }
 0x577   :  { %1712 = vst [vmem:[#allocation10 + $0x58] sm:$0xff] %v1633_v3 }
 0x578   :  { %v1637_v36 = vpop.f32.mrb[50].mxu0 }
 0x579   :  { %v1638_v0 = vadd.f32 %v3729_v56, %v1637_v36  ;;  %v2143_v40 = vpop.f32.mrb[51].mxu0 }
 0x57b   :  { %1713 = vst [vmem:[#allocation10 + $0x60] sm:$0xff] %v1638_v0 }
 0x57c   :  { %v1642_v53 = vpop.f32.mrb[52].mxu0 }
 0x57d   :  { %v1643_v8 = vadd.f32 %v3729_v56, %v1642_v53  ;;  %v2146_v33 = vpop.f32.mrb[53].mxu0 }
 0x57f   :  { %1714 = vst [vmem:[#allocation10 + $0x68] sm:$0xff] %v1643_v8 }
 0x580   :  { %v1647_v39 = vpop.f32.mrb[54].mxu0 }
 0x581   :  { %v1648_v5 = vadd.f32 %v3729_v56, %v1647_v39  ;;  %v2149_v13 = vpop.f32.mrb[55].mxu0 }
 0x583   :  { %1715 = vst [vmem:[#allocation10 + $0x70] sm:$0xff] %v1648_v5 }
 0x584   :  { %v1652_v9 = vpop.f32.mrb[56].mxu0 }
 0x585   :  { %v1653_v29 = vadd.f32 %v3729_v56, %v1652_v9  ;;  %v2152_v62 = vpop.f32.mrb[57].mxu0 }
 0x587   :  { %1716 = vst [vmem:[#allocation10 + $0x78] sm:$0xff] %v1653_v29 }
 0x588   :  { %v1657_v34 = vpop.f32.mrb[58].mxu0 }
 0x589   :  { %v1658_v24 = vadd.f32 %v3729_v56, %v1657_v34  ;;  %v2155_v28 = vpop.f32.mrb[59].mxu0 }
 0x58b   :  { %1717 = vst [vmem:[#allocation10 + $0x80] sm:$0xff] %v1658_v24 }
 0x58c   :  { %v1662_v37 = vpop.f32.mrb[60].mxu0 }
 0x58d   :  { %v1663_v49 = vadd.f32 %v3729_v56, %v1662_v37  ;;  %v2158_v57 = vpop.f32.mrb[61].mxu0 }
 0x58f   :  { %1718 = vst [vmem:[#allocation10 + $0x88] sm:$0xff] %v1663_v49 }
 0x590   :  { %v1667_v41 = vpop.f32.mrb[62].mxu0 }
 0x591   :  { %v1668_v52 = vadd.f32 %v3729_v56, %v1667_v41  ;;  %v2161_v46 = vpop.f32.mrb[63].mxu0 }
 0x593   :  { %1719 = vst [vmem:[#allocation10 + $0x90] sm:$0xff] %v1668_v52 }
 0x594   :  { %v1672_v22 = vpop.f32.mrb[64].mxu0 }
 0x595   :  { %v1673_v60 = vadd.f32 %v3729_v56, %v1672_v22  ;;  %v2164_v10 = vpop.f32.mrb[65].mxu0 }
 0x597   :  { %1720 = vst [vmem:[#allocation10 + $0x98] sm:$0xff] %v1673_v60 }
 0x598   :  { %v1677_v11 = vpop.f32.mrb[66].mxu0 }
 0x599   :  { %v1678_v51 = vadd.f32 %v3729_v56, %v1677_v11  ;;  %v2167_v4 = vpop.f32.mrb[67].mxu0 }
 0x59b   :  { %1721 = vst [vmem:[#allocation10 + $0xa0] sm:$0xff] %v1678_v51 }
 0x59c   :  { %v1682_v15 = vpop.f32.mrb[68].mxu0 }
 0x59d   :  { %v1683_v59 = vadd.f32 %v3729_v56, %v1682_v15  ;;  %v2170_v48 = vpop.f32.mrb[69].mxu0 }
 0x59f   :  { %1722 = vst [vmem:[#allocation10 + $0xa8] sm:$0xff] %v1683_v59 }
 0x5a0   :  { %v1687_v35 = vpop.f32.mrb[70].mxu0 }
 0x5a1   :  { %v1688_v16 = vadd.f32 %v3729_v56, %v1687_v35  ;;  %v2173_v43 = vpop.f32.mrb[71].mxu0 }
 0x5a3   :  { %1723 = vst [vmem:[#allocation10 + $0xb0] sm:$0xff] %v1688_v16 }
 0x5a4   :  { %v1692_v55 = vpop.f32.mrb[72].mxu0 }
 0x5a5   :  { %v1693_v1 = vadd.f32 %v3729_v56, %v1692_v55  ;;  %v2176_v23 = vpop.f32.mrb[73].mxu0 }
 0x5a7   :  { %1724 = vst [vmem:[#allocation10 + $0xb8] sm:$0xff] %v1693_v1 }
 0x5a8   :  { %v1697_v54 = vpop.f32.mrb[74].mxu0 }
 0x5a9   :  { %v1698_v47 = vadd.f32 %v3729_v56, %v1697_v54  ;;  %v2179_v58 = vpop.f32.mrb[75].mxu0 }
 0x5ab   :  { %1725 = vst [vmem:[#allocation10 + $0xc0] sm:$0xff] %v1698_v47 }
 0x5ac   :  { %2444 = shalt.err (!%p2441_p8)
}
 0x5ad   :  { %s2445_s19 = scalar_lea.hbm %s3782_s11, 3200 }
 0x5ae   :  { %p2446_p9 = scmp.ne.s32.totalorder %s3782_s11, %s2445_s19  ;;  %p2449_p10 = scmp.lt.u32.totalorder %s2445_s19, %s3782_s11 }
 0x5b0   :  { %p2451_p11 = pnand %p2449_p10, %p2446_p9 }
 0x5b2   :  { %2454 = shalt.err (!%p2451_p11)
}
 0x5b3   :  { %1737 = dma.vmem_to_hbm [thread:$0]  %s1732_s16, 3200, %s3782_s11, [#allocation4], %s2465_s4, %s2465_s4, %s2466_s18  }
 0x5b4   :  { %2461 = dma.done.wait [#allocation4], 3200  }
 0x5b5   :  { %2462 = vsyncadd [#allocation4], 4294964096 }
 0x5b6   :  { %1741 = vsyncpa [#allocation3], 1 }
 0x5b7   :  { %1742 = vsyncpa [#allocation6], 1 }
 0x5b8   :  { %1743 = vsyncpa [#allocation9], 1 }
 0x5b9   :  { %1744 = vsyncpa [#allocation4], 1 }

</bundles_post_ra>
